<compile_context>
chip_gen: v7x
topology: tpu7x:2x2x1
jax: 0.10.0
libtpu: 0.0.40
codegen_flags: <defaults>
</compile_context>

<pallas_src>
import jax
import jax.numpy as jnp
from jax.experimental import pallas as pl
from jax.experimental.pallas import tpu as pltpu

# ----------------------------- configuration -------------------------------
VOX = 8                           # voxel grid resolution (D = H = W = VOX)
V = VOX * VOX * VOX               # 512 (lane dimension inside the kernel)
FEAT = 3                          # rgb feature channels per pixel
C_SCAT = 3 + FEAT + 1             # scattered rows: xyz-sum, feat-sum, count (= 7)
C_VOX = 3 + FEAT + 3 + 1          # avg-xyz, avg-feat, voxel-center-xyz, occupancy (= 10)
ROT_RES = 45.0                    # rotation_resolution
NUM_ROT_BINS = int(360 // ROT_RES)
R_OUT = 3 * NUM_ROT_BINS + 2      # q_rot_grip width (3 axes + 2 grip logits)
PROPRIO_DIM = 4
LANG_DIM = 32
NUM_TOKENS = 8
HEAD_IN = C_VOX + PROPRIO_DIM + LANG_DIM + LANG_DIM   # 78
HEAD_OUT = R_OUT + 2                                  # 28 (rot/grip + collision)
MAX_TILE_N = 2048                 # point-chunk size (VMEM-safe on v5e/v6e/v7x)


def _round_up(x, m):
    return ((x + m - 1) // m) * m


# --------------------------- fused forward kernel ---------------------------
def _fused_voxelize_qnet_kernel(
        bounds_ref, coords_ref, feats_ref, wgt_ref, proprio_ref, lang_ref,
        tok_ref, cidx_ref, w_t_ref, b_t_ref, w_head_ref, b_head_ref,
        vox_ref, q_trans_ref, q_heads_ref,
        scat_ref):
    """Voxelize (factored scatter-average via MXU) + q-net heads, fused."""
    k = pl.program_id(1)

    @pl.when(k == 0)
    def _():
        scat_ref[...] = jnp.zeros_like(scat_ref)

    bnds = bounds_ref[0]                       # (3, 2): col0 = min, col1 = max
    bmin = bnds[:, 0:1]                        # (3, 1)
    bmax = bnds[:, 1:2]                        # (3, 1)
    res = (bmax - bmin) * (1.0 / VOX)          # (3, 1)
    inv_res = 1.0 / (res + 1e-12)              # 3 divides total, not 3*tile_n

    coords = coords_ref[0]                     # (3, tile_n)  channel-first
    feats = feats_ref[0]                       # (FEAT, tile_n)
    wrow = wgt_ref[0]                          # (1, tile_n)  1 = real point, 0 = pad
    tile_n = coords.shape[-1]

    # per-point voxel index, clipped to grid
    # TODO(synk): reference VoxelGrid clamps out-of-bounds points to edge
    # voxels as well; points are never dropped here.
    idx = jnp.floor((coords - bmin) * inv_res)
    idx = jnp.clip(idx, 0.0, float(VOX - 1)).astype(jnp.int32)       # (3, tile_n)
    x_bin = idx[0:1]                                                 # (1, tile_n) 0..7
    yz_bin = idx[1:2] * VOX + idx[2:3]                               # (1, tile_n) 0..63

    # two-level factored one-hot:  flat voxel index v = x*64 + (y*8 + z)
    oh_x = (jax.lax.broadcasted_iota(jnp.int32, (VOX, 1), 0) == x_bin
            ).astype(jnp.float32)                                    # (8, tile_n)
    oh_yz = (jax.lax.broadcasted_iota(jnp.int32, (VOX * VOX, 1), 0) == yz_bin
             ).astype(jnp.float32)                                   # (64, tile_n)

    # Padded columns are all-zero in vals (zero-padded coords/feats, wrow=0),
    # so they contribute nothing to any voxel — no extra masking multiplies.
    vals = jnp.concatenate([coords, feats, wrow], axis=0)            # (7, tile_n)
    expanded = (oh_x[:, None, :] * vals[None, :, :]
                ).reshape(VOX * C_SCAT, tile_n)                      # (56, tile_n)

    # scatter matmul on MXU: (56, tile_n) @ (64, tile_n)^T -> (56, 64)
    scat_ref[...] += jax.lax.dot_general(
        expanded, oh_yz, (((1,), (1,)), ((), ())),
        preferred_element_type=jnp.float32)

    @pl.when(k == pl.num_programs(1) - 1)
    def _():
        scat2 = scat_ref[...]                                        # (56, 64), row = x*7+c
        # un-factor: scattered[c, x*64 + h] = scat2[x*7 + c, h]
        scattered = jnp.concatenate(
            [scat2[x * C_SCAT:(x + 1) * C_SCAT, :] for x in range(VOX)],
            axis=1)                                                  # (C_SCAT, V)
        counts = scattered[C_SCAT - 1:C_SCAT, :]                     # (1, V)
        avg = scattered[0:C_SCAT - 1, :] / jnp.maximum(counts, 1.0)  # exact (epilogue only)
        occ = (counts > 0.0).astype(jnp.float32)                     # (1, V)
        centers = bmin + (cidx_ref[...] + 0.5) * res                 # (3, V)
        vox = jnp.concatenate([avg, centers, occ], axis=0)           # (C_VOX, V)
        vox_ref[0] = vox                                             # lane-dense store

        # per-voxel translation logits (1x1x1 conv), lane-dense (1, V)
        q_trans_ref[0] = (jnp.dot(w_t_ref[...], vox,
                                  preferred_element_type=jnp.float32)
                          + b_t_ref[...])

        # pooled features -> single fused head matmul (rot/grip + collision)
        g_v = jax.lax.dot_general(
            jnp.full((1, V), 1.0 / V, jnp.float32), vox,
            (((1,), (1,)), ((), ())),
            preferred_element_type=jnp.float32)                      # (1, C_VOX)
        tok_mean = jnp.mean(tok_ref[0], axis=0, keepdims=True)       # (1, LANG_DIM)
        head_in = jnp.concatenate(
            [g_v, proprio_ref[0], lang_ref[0], tok_mean], axis=-1)   # (1, HEAD_IN)
        q_heads_ref[0] = (jnp.dot(head_in, w_head_ref[...],
                                  preferred_element_type=jnp.float32)
                          + b_head_ref[...])                         # (1, HEAD_OUT)


def q_forward_fused(pcd_cf, feats_cf, bounds, proprio, lang_goal_emb,
                    lang_token_embs, params):
    """pcd_cf: (B, 3, N), feats_cf: (B, FEAT, N), bounds: (B, 6).

    Returns (voxel_grid (B, C_VOX, V), q_trans (B, 1, V), q_heads (B, 1, HEAD_OUT)).
    """
    b, _, n = pcd_cf.shape
    tile_n = min(MAX_TILE_N, _round_up(n, 128))
    n_chunks = pl.cdiv(n, tile_n)
    n_pad = n_chunks * tile_n

    pcd_cf = pcd_cf.astype(jnp.float32)
    feats_cf = feats_cf.astype(jnp.float32)
    if n_pad != n:
        pad = ((0, 0), (0, 0), (0, n_pad - n))
        pcd_cf = jnp.pad(pcd_cf, pad)
        feats_cf = jnp.pad(feats_cf, pad)
    # per-point weight row (1 = real point, 0 = pad), shared across batch
    weights = (jnp.arange(n_pad) < n).astype(jnp.float32).reshape(1, 1, n_pad)

    # bounds (B, 6)=[mins, maxs] -> channel-first (B, 3, 2)
    bounds_cf = jnp.transpose(bounds.reshape(b, 2, 3), (0, 2, 1)).astype(jnp.float32)
    prop3 = proprio.reshape(b, 1, PROPRIO_DIM).astype(jnp.float32)
    lang3 = lang_goal_emb.reshape(b, 1, LANG_DIM).astype(jnp.float32)
    tok3 = lang_token_embs.astype(jnp.float32)

    # precomputed voxel-center index table (3, V): flat index = x*64 + y*8 + z
    v_idx = jnp.arange(V, dtype=jnp.int32)
    cidx = jnp.stack([v_idx // (VOX * VOX), (v_idx // VOX) % VOX, v_idx % VOX],
                     axis=0).astype(jnp.float32)

    in_specs = [
        pl.BlockSpec((1, 3, 2), lambda i, k: (i, 0, 0)),               # bounds
        pl.BlockSpec((1, 3, tile_n), lambda i, k: (i, 0, k)),          # coords chunk
        pl.BlockSpec((1, FEAT, tile_n), lambda i, k: (i, 0, k)),       # feats chunk
        pl.BlockSpec((1, 1, tile_n), lambda i, k: (0, 0, k)),          # weight row chunk
        pl.BlockSpec((1, 1, PROPRIO_DIM), lambda i, k: (i, 0, 0)),     # proprio
        pl.BlockSpec((1, 1, LANG_DIM), lambda i, k: (i, 0, 0)),        # lang goal emb
        pl.BlockSpec((1, NUM_TOKENS, LANG_DIM), lambda i, k: (i, 0, 0)),  # lang tokens
        pl.BlockSpec((3, V), lambda i, k: (0, 0)),                     # cidx (shared)
        pl.BlockSpec((1, C_VOX), lambda i, k: (0, 0)),                 # w_t_row
        pl.BlockSpec((1, 1), lambda i, k: (0, 0)),                     # b_t
        pl.BlockSpec((HEAD_IN, HEAD_OUT), lambda i, k: (0, 0)),        # w_head
        pl.BlockSpec((1, HEAD_OUT), lambda i, k: (0, 0)),              # b_head
    ]
    out_shape = (
        jax.ShapeDtypeStruct((b, C_VOX, V), jnp.float32),
        jax.ShapeDtypeStruct((b, 1, V), jnp.float32),
        jax.ShapeDtypeStruct((b, 1, HEAD_OUT), jnp.float32),
    )
    out_specs = [
        pl.BlockSpec((1, C_VOX, V), lambda i, k: (i, 0, 0)),
        pl.BlockSpec((1, 1, V), lambda i, k: (i, 0, 0)),
        pl.BlockSpec((1, 1, HEAD_OUT), lambda i, k: (i, 0, 0)),
    ]

    # TODO(synk): for B=1 on v7x one of the two TensorCores sits idle; a
    # point-chunk core split (per-core partial scatter + combine) would double
    # throughput there.
    return pl.pallas_call(
        _fused_voxelize_qnet_kernel,
        out_shape=out_shape,
        grid_spec=pltpu.PrefetchScalarGridSpec(
            num_scalar_prefetch=0,
            grid=(b, n_chunks),
            in_specs=in_specs,
            out_specs=out_specs,
            scratch_shapes=[pltpu.VMEM((VOX * C_SCAT, VOX * VOX), jnp.float32)],
        ),
        compiler_params=pltpu.CompilerParams(
            dimension_semantics=("parallel", "arbitrary")),
    )(bounds_cf, pcd_cf, feats_cf, weights, prop3, lang3, tok3, cidx,
      params["w_t_row"], params["b_t"], params["w_head"], params["b_head"])


# ------------------------------ QFunction wrapper ---------------------------
class QFunctionPallas:
    """JAX/Pallas re-implementation of QFunction.forward (synthetic qnet/voxelizer)."""

    def __init__(self, rotation_resolution=ROT_RES, seed=42):
        self._rotation_resolution = rotation_resolution
        k = jax.random.split(jax.random.PRNGKey(seed), 10)
        s = 0.1
        w_t = s * jax.random.normal(k[0], (C_VOX, 1), jnp.float32)
        b_t = jnp.zeros((1, 1), jnp.float32)
        w_rg_v = s * jax.random.normal(k[1], (C_VOX, R_OUT), jnp.float32)
        w_rg_p = s * jax.random.normal(k[2], (PROPRIO_DIM, R_OUT), jnp.float32)
        w_rg_l = s * jax.random.normal(k[3], (LANG_DIM, R_OUT), jnp.float32)
        w_rg_t = s * jax.random.normal(k[4], (LANG_DIM, R_OUT), jnp.float32)
        b_rg = jnp.zeros((1, R_OUT), jnp.float32)
        w_c_v = s * jax.random.normal(k[5], (C_VOX, 2), jnp.float32)
        w_c_p = s * jax.random.normal(k[6], (PROPRIO_DIM, 2), jnp.float32)
        w_c_l = s * jax.random.normal(k[7], (LANG_DIM, 2), jnp.float32)
        w_c_t = s * jax.random.normal(k[8], (LANG_DIM, 2), jnp.float32)
        b_c = jnp.zeros((1, 2), jnp.float32)

        # Pre-fuse the eight tiny per-head weights into one (HEAD_IN, HEAD_OUT)
        # matrix + one bias row; translation weight stored as a row vector.
        self.params = {
            "w_t_row": w_t.T,                                           # (1, C_VOX)
            "b_t": b_t,                                                 # (1, 1)
            "w_head": jnp.concatenate([
                jnp.concatenate([w_rg_v, w_c_v], axis=1),
                jnp.concatenate([w_rg_p, w_c_p], axis=1),
                jnp.concatenate([w_rg_l, w_c_l], axis=1),
                jnp.concatenate([w_rg_t, w_c_t], axis=1)], axis=0),     # (78, 28)
            "b_head": jnp.concatenate([b_rg, b_c], axis=1),             # (1, 28)
        }

    # ---- same semantics as the torch helpers (cheap glue, plain JAX) ----
    def _argmax_3d(self, tensor_orig):
        # NOTE: index decode mirrors the original PerAct code; valid for cubic grids.
        b, c, d, h, w = tensor_orig.shape
        idxs = jnp.argmax(tensor_orig.reshape(b, c, -1), axis=-1)
        indices = jnp.concatenate([idxs // h // d, idxs // h % w, idxs % w], axis=1)
        return indices

    def choose_highest_action(self, q_trans, q_rot_grip, q_collision):
        coords = self._argmax_3d(q_trans)
        rot_and_grip_indicies = None
        ignore_collision = None
        if q_rot_grip is not None:
            q_rot = jnp.stack(jnp.split(q_rot_grip[:, :-2], 3, axis=1), axis=1)
            rot_and_grip_indicies = jnp.concatenate(
                [jnp.argmax(q_rot[:, 0:1], axis=-1),
                 jnp.argmax(q_rot[:, 1:2], axis=-1),
                 jnp.argmax(q_rot[:, 2:3], axis=-1),
                 jnp.argmax(q_rot_grip[:, -2:], axis=-1, keepdims=True)], axis=-1)
            ignore_collision = jnp.argmax(q_collision[:, -2:], axis=-1, keepdims=True)
        return coords, rot_and_grip_indicies, ignore_collision

    def forward(self, rgb_pcd, proprio, pcd, lang_goal_emb, lang_token_embs,
                bounds=None, prev_bounds=None, prev_layer_voxel_grid=None):
        # TODO(synk): prev_bounds / prev_layer_voxel_grid are consumed by the
        # real PerceiverIO qnet; the synthetic qnet here ignores them.
        b = rgb_pcd[0][0].shape[0]

        # Channel-first flattening: NCHW -> (B, 3, H*W), concat over cameras.
        # Per-point pairing is identical to the torch (B, H*W, 3) flattening.
        pcd_flat = jnp.concatenate([p.reshape(b, 3, -1) for p in pcd], axis=-1)

        rgb = [rp[0] for rp in rgb_pcd]
        feat_size = rgb[0].shape[1]
        flat_imag_features = jnp.concatenate(
            [p.reshape(b, feat_size, -1) for p in rgb], axis=-1)

        if bounds.shape[0] != b:
            bounds = jnp.tile(bounds, (b, 1))

        # --- single fused Pallas kernel: voxelize + q-net heads ---
        vox_cv, q_trans_flat, q_heads = q_forward_fused(
            pcd_flat, flat_imag_features, bounds,
            proprio, lang_goal_emb, lang_token_embs, self.params)

        # (B, C_VOX, V) is already channel-first: reshape only -> NCDHW
        voxel_grid = vox_cv.reshape(b, C_VOX, VOX, VOX, VOX)
        q_trans = q_trans_flat.reshape(b, 1, VOX, VOX, VOX)

        q_heads2 = q_heads.reshape(b, HEAD_OUT)
        q_rot_grip = q_heads2[:, :R_OUT]
        q_collision = q_heads2[:, R_OUT:]

        split_pred = (q_trans, q_rot_grip, q_collision)
        return split_pred, voxel_grid


# ----------------------------------- main -----------------------------------
if __name__ == "__main__":
    key = jax.random.PRNGKey(0)
    B, CAMS, IMG = 2, 2, 16
    keys = jax.random.split(key, 12)

    rgb = [jax.random.normal(keys[i], (B, FEAT, IMG, IMG), jnp.float32)
           for i in range(CAMS)]
    pcd = [jax.random.uniform(keys[4 + i], (B, 3, IMG, IMG), jnp.float32)
           for i in range(CAMS)]
    rgb_pcd = [[rgb[i], pcd[i]] for i in range(CAMS)]

    proprio = jax.random.normal(keys[8], (B, PROPRIO_DIM), jnp.float32)
    lang_goal_emb = jax.random.normal(keys[9], (B, LANG_DIM), jnp.float32)
    lang_token_embs = jax.random.normal(keys[10], (B, NUM_TOKENS, LANG_DIM), jnp.float32)
    bounds = jnp.array([[0.0, 0.0, 0.0, 1.0, 1.0, 1.0]], jnp.float32)   # (1, 6)

    qfn = QFunctionPallas(rotation_resolution=ROT_RES)
    (q_trans, q_rot_grip, q_collision), voxel_grid = qfn.forward(
        rgb_pcd, proprio, pcd, lang_goal_emb, lang_token_embs, bounds=bounds)

    coords, rot_grip_idx, ignore_col = qfn.choose_highest_action(
        q_trans, q_rot_grip, q_collision)

    jax.block_until_ready((q_trans, q_rot_grip, q_collision, voxel_grid,
                           coords, rot_grip_idx, ignore_col))

    assert q_trans.shape == (B, 1, VOX, VOX, VOX)
    assert q_rot_grip.shape == (B, R_OUT)
    assert q_collision.shape == (B, 2)
    assert voxel_grid.shape == (B, C_VOX, VOX, VOX, VOX)
    assert coords.shape == (B, 3)
    assert bool(jnp.all(jnp.isfinite(q_trans)))
    assert bool(jnp.all(jnp.isfinite(voxel_grid)))
    print("KERNEL_OK")
</pallas_src>

<mosaic_0001>
module attributes {stable_mosaic.version = 11 : i64} {
  func.func @_fused_voxelize_qnet_kernel(%arg0: i32, %arg1: i32, %arg2: memref<1x3x2xf32, #tpu.memory_space<vmem>>, %arg3: memref<1x3x512xf32, #tpu.memory_space<vmem>>, %arg4: memref<1x3x512xf32, #tpu.memory_space<vmem>>, %arg5: memref<1x1x512xf32, #tpu.memory_space<vmem>>, %arg6: memref<1x1x4xf32, #tpu.memory_space<vmem>>, %arg7: memref<1x1x32xf32, #tpu.memory_space<vmem>>, %arg8: memref<1x8x32xf32, #tpu.memory_space<vmem>>, %arg9: memref<3x512xf32, #tpu.memory_space<vmem>>, %arg10: memref<1x10xf32, #tpu.memory_space<vmem>>, %arg11: memref<1x1xf32, #tpu.memory_space<vmem>>, %arg12: memref<78x28xf32, #tpu.memory_space<vmem>>, %arg13: memref<1x28xf32, #tpu.memory_space<vmem>>, %arg14: memref<1x10x512xf32, #tpu.memory_space<vmem>>, %arg15: memref<1x1x512xf32, #tpu.memory_space<vmem>>, %arg16: memref<1x1x28xf32, #tpu.memory_space<vmem>>, %arg17: memref<56x64xf32, #tpu.memory_space<vmem>>) attributes {dimension_semantics = [#tpu.dimension_semantics<parallel>, #tpu.dimension_semantics<arbitrary>], iteration_bounds = array<i64: 2, 1>, scalar_prefetch = 0 : i64, scratch_operands = 1 : i64, tpu.core_type = #tpu.core_type<tc>, window_params = [{transform_indices = @transform_0, window_bounds = array<i64: 1, 3, 2>}, {transform_indices = @transform_1, window_bounds = array<i64: 1, 3, 512>}, {transform_indices = @transform_2, window_bounds = array<i64: 1, 3, 512>}, {transform_indices = @transform_3, window_bounds = array<i64: 1, 1, 512>}, {transform_indices = @transform_4, window_bounds = array<i64: 1, 1, 4>}, {transform_indices = @transform_5, window_bounds = array<i64: 1, 1, 32>}, {transform_indices = @transform_6, window_bounds = array<i64: 1, 8, 32>}, {pipeline_mode = #tpu.pipeline_mode<synchronous>, transform_indices = @transform_7, window_bounds = array<i64: 3, 512>}, {pipeline_mode = #tpu.pipeline_mode<synchronous>, transform_indices = @transform_8, window_bounds = array<i64: 1, 10>}, {pipeline_mode = #tpu.pipeline_mode<synchronous>, transform_indices = @transform_9, window_bounds = array<i64: 1, 1>}, {pipeline_mode = #tpu.pipeline_mode<synchronous>, transform_indices = @transform_10, window_bounds = array<i64: 78, 28>}, {pipeline_mode = #tpu.pipeline_mode<synchronous>, transform_indices = @transform_11, window_bounds = array<i64: 1, 28>}, {transform_indices = @transform_12, window_bounds = array<i64: 1, 10, 512>}, {transform_indices = @transform_13, window_bounds = array<i64: 1, 1, 512>}, {transform_indices = @transform_14, window_bounds = array<i64: 1, 1, 28>}]} {
    %c0_i32 = arith.constant 0 : i32
    %0 = arith.cmpi eq, %arg1, %c0_i32 : i32
    %1 = arith.extui %0 : i1 to i32
    %c0_i32_0 = arith.constant 0 : i32
    %2 = arith.cmpi ne, %1, %c0_i32_0 : i32
    scf.if %2 {
      %cst_23 = arith.constant 0.000000e+00 : f32
      %62 = vector.broadcast %cst_23 : f32 to vector<56x64xf32>
      %c0_24 = arith.constant 0 : index
      %c0_25 = arith.constant 0 : index
      %63 = vector.load %arg17[%c0_24, %c0_25] : memref<56x64xf32, #tpu.memory_space<vmem>>, vector<56x64xf32>
      tpu.vector_store %arg17[%c0_24, %c0_25], %62 {strides = array<i32>} : memref<56x64xf32, #tpu.memory_space<vmem>>, vector<56x64xf32>,
    } else {
    }
    %c0 = arith.constant 0 : index
    %c0_1 = arith.constant 0 : index
    %c0_2 = arith.constant 0 : index
    %3 = vector.load %arg2[%c0, %c0_1, %c0_2] : memref<1x3x2xf32, #tpu.memory_space<vmem>>, vector<1x3x2xf32>
    %4 = vector.shape_cast %3 : vector<1x3x2xf32> to vector<3x2xf32>
    %5 = vector.extract_strided_slice %4 {offsets = [0, 0], sizes = [3, 1], strides = [1, 1]} : vector<3x2xf32> to vector<3x1xf32>
    %6 = vector.extract_strided_slice %4 {offsets = [0, 1], sizes = [3, 1], strides = [1, 1]} : vector<3x2xf32> to vector<3x1xf32>
    %7 = arith.subf %6, %5 : vector<3x1xf32>
    %cst = arith.constant 1.250000e-01 : f32
    %8 = vector.broadcast %cst : f32 to vector<3x1xf32>
    %9 = arith.mulf %7, %8 : vector<3x1xf32>
    %cst_3 = arith.constant 9.99999996E-13 : f32
    %10 = vector.broadcast %cst_3 : f32 to vector<3x1xf32>
    %11 = arith.addf %9, %10 : vector<3x1xf32>
    %cst_4 = arith.constant 1.000000e+00 : f32
    %12 = vector.broadcast %cst_4 : f32 to vector<3x1xf32>
    %13 = arith.divf %12, %11 : vector<3x1xf32>
    %c0_5 = arith.constant 0 : index
    %c0_6 = arith.constant 0 : index
    %c0_7 = arith.constant 0 : index
    %14 = vector.load %arg3[%c0_5, %c0_6, %c0_7] : memref<1x3x512xf32, #tpu.memory_space<vmem>>, vector<1x3x512xf32>
    %15 = vector.shape_cast %14 : vector<1x3x512xf32> to vector<3x512xf32>
    %c0_8 = arith.constant 0 : index
    %c0_9 = arith.constant 0 : index
    %c0_10 = arith.constant 0 : index
    %16 = vector.load %arg4[%c0_8, %c0_9, %c0_10] : memref<1x3x512xf32, #tpu.memory_space<vmem>>, vector<1x3x512xf32>
    %17 = vector.shape_cast %16 : vector<1x3x512xf32> to vector<3x512xf32>
    %c0_11 = arith.constant 0 : index
    %c0_12 = arith.constant 0 : index
    %c0_13 = arith.constant 0 : index
    %18 = vector.load %arg5[%c0_11, %c0_12, %c0_13] : memref<1x1x512xf32, #tpu.memory_space<vmem>>, vector<1x1x512xf32>
    %19 = vector.shape_cast %18 : vector<1x1x512xf32> to vector<1x512xf32>
    %20 = vector.broadcast %5 : vector<3x1xf32> to vector<3x512xf32>
    %21 = arith.subf %15, %20 : vector<3x512xf32>
    %22 = vector.broadcast %13 : vector<3x1xf32> to vector<3x512xf32>
    %23 = arith.mulf %21, %22 : vector<3x512xf32>
    %24 = math.floor %23 : vector<3x512xf32>
    %cst_14 = arith.constant 0.000000e+00 : f32
    %cst_15 = arith.constant 7.000000e+00 : f32
    %25 = vector.broadcast %cst_14 : f32 to vector<3x512xf32>
    %26 = arith.maximumf %25, %24 : vector<3x512xf32>
    %27 = vector.broadcast %cst_15 : f32 to vector<3x512xf32>
    %28 = arith.minimumf %27, %26 : vector<3x512xf32>
    %29 = arith.fptosi %28 : vector<3x512xf32> to vector<3x512xi32>
    %30 = vector.extract_strided_slice %29 {offsets = [0, 0], sizes = [1, 512], strides = [1, 1]} : vector<3x512xi32> to vector<1x512xi32>
    %31 = vector.extract_strided_slice %29 {offsets = [1, 0], sizes = [1, 512], strides = [1, 1]} : vector<3x512xi32> to vector<1x512xi32>
    %c8_i32 = arith.constant 8 : i32
    %32 = vector.broadcast %c8_i32 : i32 to vector<1x512xi32>
    %33 = arith.muli %31, %32 : vector<1x512xi32>
    %34 = vector.extract_strided_slice %29 {offsets = [2, 0], sizes = [1, 512], strides = [1, 1]} : vector<3x512xi32> to vector<1x512xi32>
    %35 = arith.addi %33, %34 : vector<1x512xi32>
    %36 = tpu.iota {dimensions = array<i32: 0>} : vector<8x1xi32>
    %37 = vector.broadcast %36 : vector<8x1xi32> to vector<8x512xi32>
    %38 = vector.broadcast %30 : vector<1x512xi32> to vector<8x512xi32>
    %39 = arith.cmpi eq, %37, %38 : vector<8x512xi32>
    %40 = arith.extui %39 : vector<8x512xi1> to vector<8x512xi32>
    %41 = arith.sitofp %40 : vector<8x512xi32> to vector<8x512xf32>
    %42 = tpu.iota {dimensions = array<i32: 0>} : vector<64x1xi32>
    %43 = vector.broadcast %42 : vector<64x1xi32> to vector<64x512xi32>
    %44 = vector.broadcast %35 : vector<1x512xi32> to vector<64x512xi32>
    %45 = arith.cmpi eq, %43, %44 : vector<64x512xi32>
    %46 = arith.extui %45 : vector<64x512xi1> to vector<64x512xi32>
    %47 = arith.sitofp %46 : vector<64x512xi32> to vector<64x512xf32>
    %48 = tpu.concatenate %15, %17, %19 in 0 : vector<3x512xf32>, vector<3x512xf32>, vector<1x512xf32> -> vector<7x512xf32>
    %49 = vector.shape_cast %41 : vector<8x512xf32> to vector<8x1x512xf32>
    %50 = vector.shape_cast %48 : vector<7x512xf32> to vector<1x7x512xf32>
    %51 = vector.broadcast %49 : vector<8x1x512xf32> to vector<8x7x512xf32>
    %52 = vector.broadcast %50 : vector<1x7x512xf32> to vector<8x7x512xf32>
    %53 = arith.mulf %51, %52 : vector<8x7x512xf32>
    %54 = vector.shape_cast %53 : vector<8x7x512xf32> to vector<56x512xf32>
    %c0_16 = arith.constant 0 : index
    %c0_17 = arith.constant 0 : index
    %55 = vector.load %arg17[%c0_16, %c0_17] : memref<56x64xf32, #tpu.memory_space<vmem>>, vector<56x64xf32>
    %cst_18 = arith.constant dense<0.000000e+00> : vector<56x64xf32>
    %56 = tpu.matmul %54, %47, %cst_18 {dimension_numbers = #tpu.dot_dimension_numbers<[1], [1], [0], [0], [0, 0, 1, 0], [], []>} : vector<56x512xf32>, vector<64x512xf32>, vector<56x64xf32> -> vector<56x64xf32>
    %57 = arith.addf %55, %56 : vector<56x64xf32>
    %c0_19 = arith.constant 0 : index
    %c0_20 = arith.constant 0 : index
    %58 = vector.load %arg17[%c0_19, %c0_20] : memref<56x64xf32, #tpu.memory_space<vmem>>, vector<56x64xf32>
    tpu.vector_store %arg17[%c0_19, %c0_20], %57 {strides = array<i32>} : memref<56x64xf32, #tpu.memory_space<vmem>>, vector<56x64xf32>,
    %c0_i32_21 = arith.constant 0 : i32
    %59 = arith.cmpi eq, %arg1, %c0_i32_21 : i32
    %60 = arith.extui %59 : i1 to i32
    %c0_i32_22 = arith.constant 0 : i32
    %61 = arith.cmpi ne, %60, %c0_i32_22 : i32
    scf.if %61 {
      %c0_23 = arith.constant 0 : index
      %c0_24 = arith.constant 0 : index
      %62 = vector.load %arg17[%c0_23, %c0_24] : memref<56x64xf32, #tpu.memory_space<vmem>>, vector<56x64xf32>
      %63 = vector.extract_strided_slice %62 {offsets = [0, 0], sizes = [7, 64], strides = [1, 1]} : vector<56x64xf32> to vector<7x64xf32>
      %64 = vector.extract_strided_slice %62 {offsets = [7, 0], sizes = [7, 64], strides = [1, 1]} : vector<56x64xf32> to vector<7x64xf32>
      %65 = vector.extract_strided_slice %62 {offsets = [14, 0], sizes = [7, 64], strides = [1, 1]} : vector<56x64xf32> to vector<7x64xf32>
      %66 = vector.extract_strided_slice %62 {offsets = [21, 0], sizes = [7, 64], strides = [1, 1]} : vector<56x64xf32> to vector<7x64xf32>
      %67 = vector.extract_strided_slice %62 {offsets = [28, 0], sizes = [7, 64], strides = [1, 1]} : vector<56x64xf32> to vector<7x64xf32>
      %68 = vector.extract_strided_slice %62 {offsets = [35, 0], sizes = [7, 64], strides = [1, 1]} : vector<56x64xf32> to vector<7x64xf32>
      %69 = vector.extract_strided_slice %62 {offsets = [42, 0], sizes = [7, 64], strides = [1, 1]} : vector<56x64xf32> to vector<7x64xf32>
      %70 = vector.extract_strided_slice %62 {offsets = [49, 0], sizes = [7, 64], strides = [1, 1]} : vector<56x64xf32> to vector<7x64xf32>
      %71 = tpu.concatenate %63, %64, %65, %66, %67, %68, %69, %70 in 1 : vector<7x64xf32>, vector<7x64xf32>, vector<7x64xf32>, vector<7x64xf32>, vector<7x64xf32>, vector<7x64xf32>, vector<7x64xf32>, vector<7x64xf32> -> vector<7x512xf32>
      %72 = vector.extract_strided_slice %71 {offsets = [6, 0], sizes = [1, 512], strides = [1, 1]} : vector<7x512xf32> to vector<1x512xf32>
      %73 = vector.extract_strided_slice %71 {offsets = [0, 0], sizes = [6, 512], strides = [1, 1]} : vector<7x512xf32> to vector<6x512xf32>
      %cst_25 = arith.constant 1.000000e+00 : f32
      %74 = vector.broadcast %cst_25 : f32 to vector<1x512xf32>
      %75 = arith.maximumf %72, %74 : vector<1x512xf32>
      %76 = vector.broadcast %75 : vector<1x512xf32> to vector<6x512xf32>
      %77 = arith.divf %73, %76 : vector<6x512xf32>
      %cst_26 = arith.constant 0.000000e+00 : f32
      %78 = vector.broadcast %cst_26 : f32 to vector<1x512xf32>
      %79 = arith.cmpf ogt, %72, %78 : vector<1x512xf32>
      %80 = arith.extui %79 : vector<1x512xi1> to vector<1x512xi32>
      %81 = arith.sitofp %80 : vector<1x512xi32> to vector<1x512xf32>
      %c0_27 = arith.constant 0 : index
      %c0_28 = arith.constant 0 : index
      %82 = vector.load %arg9[%c0_27, %c0_28] : memref<3x512xf32, #tpu.memory_space<vmem>>, vector<3x512xf32>
      %cst_29 = arith.constant 5.000000e-01 : f32
      %83 = vector.broadcast %cst_29 : f32 to vector<3x512xf32>
      %84 = arith.addf %82, %83 : vector<3x512xf32>
      %85 = vector.broadcast %9 : vector<3x1xf32> to vector<3x512xf32>
      %86 = arith.mulf %84, %85 : vector<3x512xf32>
      %87 = vector.broadcast %5 : vector<3x1xf32> to vector<3x512xf32>
      %88 = arith.addf %87, %86 : vector<3x512xf32>
      %89 = tpu.concatenate %77, %88, %81 in 0 : vector<6x512xf32>, vector<3x512xf32>, vector<1x512xf32> -> vector<10x512xf32>
      %c0_30 = arith.constant 0 : index
      %c0_31 = arith.constant 0 : index
      %c0_32 = arith.constant 0 : index
      %90 = vector.load %arg14[%c0_30, %c0_31, %c0_32] : memref<1x10x512xf32, #tpu.memory_space<vmem>>, vector<1x10x512xf32>
      %91 = vector.shape_cast %90 : vector<1x10x512xf32> to vector<10x512xf32>
      %92 = vector.shape_cast %89 : vector<10x512xf32> to vector<1x10x512xf32>
      tpu.vector_store %arg14[%c0_30, %c0_31, %c0_32], %92 {strides = array<i32>} : memref<1x10x512xf32, #tpu.memory_space<vmem>>, vector<1x10x512xf32>,
      %c0_33 = arith.constant 0 : index
      %c0_34 = arith.constant 0 : index
      %93 = vector.load %arg10[%c0_33, %c0_34] : memref<1x10xf32, #tpu.memory_space<vmem>>, vector<1x10xf32>
      %cst_35 = arith.constant dense<0.000000e+00> : vector<1x512xf32>
      %94 = tpu.matmul %93, %89, %cst_35 {dimension_numbers = #tpu.dot_dimension_numbers<[1], [0], [0], [1], [0, 0, 1, 1], [], []>} : vector<1x10xf32>, vector<10x512xf32>, vector<1x512xf32> -> vector<1x512xf32>
      %c0_36 = arith.constant 0 : index
      %c0_37 = arith.constant 0 : index
      %95 = vector.load %arg11[%c0_36, %c0_37] : memref<1x1xf32, #tpu.memory_space<vmem>>, vector<1x1xf32>
      %96 = vector.broadcast %95 : vector<1x1xf32> to vector<1x512xf32>
      %97 = arith.addf %94, %96 : vector<1x512xf32>
      %c0_38 = arith.constant 0 : index
      %c0_39 = arith.constant 0 : index
      %c0_40 = arith.constant 0 : index
      %98 = vector.load %arg15[%c0_38, %c0_39, %c0_40] : memref<1x1x512xf32, #tpu.memory_space<vmem>>, vector<1x1x512xf32>
      %99 = vector.shape_cast %98 : vector<1x1x512xf32> to vector<1x512xf32>
      %100 = vector.shape_cast %97 : vector<1x512xf32> to vector<1x1x512xf32>
      tpu.vector_store %arg15[%c0_38, %c0_39, %c0_40], %100 {strides = array<i32>} : memref<1x1x512xf32, #tpu.memory_space<vmem>>, vector<1x1x512xf32>,
      %cst_41 = arith.constant 0.001953125 : f32
      %101 = vector.broadcast %cst_41 : f32 to vector<1x512xf32>
      %cst_42 = arith.constant dense<0.000000e+00> : vector<1x10xf32>
      %102 = tpu.matmul %101, %89, %cst_42 {dimension_numbers = #tpu.dot_dimension_numbers<[1], [1], [0], [0], [0, 0, 1, 0], [], []>} : vector<1x512xf32>, vector<10x512xf32>, vector<1x10xf32> -> vector<1x10xf32>
      %c0_43 = arith.constant 0 : index
      %c0_44 = arith.constant 0 : index
      %c0_45 = arith.constant 0 : index
      %103 = vector.load %arg8[%c0_43, %c0_44, %c0_45] : memref<1x8x32xf32, #tpu.memory_space<vmem>>, vector<1x8x32xf32>
      %104 = vector.shape_cast %103 : vector<1x8x32xf32> to vector<8x32xf32>
      %cst_46 = arith.constant dense<0.000000e+00> : vector<32xf32>
      %105 = vector.multi_reduction <add>, %104, %cst_46 [0] : vector<8x32xf32> to vector<32xf32>
      %106 = vector.shape_cast %105 : vector<32xf32> to vector<1x32xf32>
      %cst_47 = arith.constant 8.000000e+00 : f32
      %107 = vector.broadcast %cst_47 : f32 to vector<1x32xf32>
      %108 = arith.divf %106, %107 : vector<1x32xf32>
      %c0_48 = arith.constant 0 : index
      %c0_49 = arith.constant 0 : index
      %c0_50 = arith.constant 0 : index
      %109 = vector.load %arg6[%c0_48, %c0_49, %c0_50] : memref<1x1x4xf32, #tpu.memory_space<vmem>>, vector<1x1x4xf32>
      %110 = vector.shape_cast %109 : vector<1x1x4xf32> to vector<1x4xf32>
      %c0_51 = arith.constant 0 : index
      %c0_52 = arith.constant 0 : index
      %c0_53 = arith.constant 0 : index
      %111 = vector.load %arg7[%c0_51, %c0_52, %c0_53] : memref<1x1x32xf32, #tpu.memory_space<vmem>>, vector<1x1x32xf32>
      %112 = vector.shape_cast %111 : vector<1x1x32xf32> to vector<1x32xf32>
      %113 = tpu.concatenate %102, %110, %112, %108 in 1 : vector<1x10xf32>, vector<1x4xf32>, vector<1x32xf32>, vector<1x32xf32> -> vector<1x78xf32>
      %c0_54 = arith.constant 0 : index
      %c0_55 = arith.constant 0 : index
      %114 = vector.load %arg12[%c0_54, %c0_55] : memref<78x28xf32, #tpu.memory_space<vmem>>, vector<78x28xf32>
      %cst_56 = arith.constant dense<0.000000e+00> : vector<1x28xf32>
      %115 = tpu.matmul %113, %114, %cst_56 {dimension_numbers = #tpu.dot_dimension_numbers<[1], [0], [0], [1], [0, 0, 1, 1], [], []>} : vector<1x78xf32>, vector<78x28xf32>, vector<1x28xf32> -> vector<1x28xf32>
      %c0_57 = arith.constant 0 : index
      %c0_58 = arith.constant 0 : index
      %116 = vector.load %arg13[%c0_57, %c0_58] : memref<1x28xf32, #tpu.memory_space<vmem>>, vector<1x28xf32>
      %117 = arith.addf %115, %116 : vector<1x28xf32>
      %c0_59 = arith.constant 0 : index
      %c0_60 = arith.constant 0 : index
      %c0_61 = arith.constant 0 : index
      %118 = vector.load %arg16[%c0_59, %c0_60, %c0_61] : memref<1x1x28xf32, #tpu.memory_space<vmem>>, vector<1x1x28xf32>
      %119 = vector.shape_cast %118 : vector<1x1x28xf32> to vector<1x28xf32>
      %120 = vector.shape_cast %117 : vector<1x28xf32> to vector<1x1x28xf32>
      tpu.vector_store %arg16[%c0_59, %c0_60, %c0_61], %120 {strides = array<i32>} : memref<1x1x28xf32, #tpu.memory_space<vmem>>, vector<1x1x28xf32>,
    } else {
    }
    return
  }
  func.func @transform_0(%arg0: i32, %arg1: i32) -> (i32, i32, i32) {
    %c0_i32 = arith.constant 0 : i32
    %c0_i32_0 = arith.constant 0 : i32
    %c0_i32_1 = arith.constant 0 : i32
    return %arg0, %c0_i32, %c0_i32_0 : i32, i32, i32
  }
  func.func @transform_1(%arg0: i32, %arg1: i32) -> (i32, i32, i32) {
    %c0_i32 = arith.constant 0 : i32
    %c0_i32_0 = arith.constant 0 : i32
    return %arg0, %c0_i32, %arg1 : i32, i32, i32
  }
  func.func @transform_2(%arg0: i32, %arg1: i32) -> (i32, i32, i32) {
    %c0_i32 = arith.constant 0 : i32
    %c0_i32_0 = arith.constant 0 : i32
    return %arg0, %c0_i32, %arg1 : i32, i32, i32
  }
  func.func @transform_3(%arg0: i32, %arg1: i32) -> (i32, i32, i32) {
    %c0_i32 = arith.constant 0 : i32
    %c0_i32_0 = arith.constant 0 : i32
    %c0_i32_1 = arith.constant 0 : i32
    return %c0_i32, %c0_i32_0, %arg1 : i32, i32, i32
  }
  func.func @transform_4(%arg0: i32, %arg1: i32) -> (i32, i32, i32) {
    %c0_i32 = arith.constant 0 : i32
    %c0_i32_0 = arith.constant 0 : i32
    %c0_i32_1 = arith.constant 0 : i32
    return %arg0, %c0_i32, %c0_i32_0 : i32, i32, i32
  }
  func.func @transform_5(%arg0: i32, %arg1: i32) -> (i32, i32, i32) {
    %c0_i32 = arith.constant 0 : i32
    %c0_i32_0 = arith.constant 0 : i32
    %c0_i32_1 = arith.constant 0 : i32
    return %arg0, %c0_i32, %c0_i32_0 : i32, i32, i32
  }
  func.func @transform_6(%arg0: i32, %arg1: i32) -> (i32, i32, i32) {
    %c0_i32 = arith.constant 0 : i32
    %c0_i32_0 = arith.constant 0 : i32
    %c0_i32_1 = arith.constant 0 : i32
    return %arg0, %c0_i32, %c0_i32_0 : i32, i32, i32
  }
  func.func @transform_7(%arg0: i32, %arg1: i32) -> (i32, i32) {
    %c0_i32 = arith.constant 0 : i32
    %c0_i32_0 = arith.constant 0 : i32
    %c0_i32_1 = arith.constant 0 : i32
    return %c0_i32, %c0_i32_0 : i32, i32
  }
  func.func @transform_8(%arg0: i32, %arg1: i32) -> (i32, i32) {
    %c0_i32 = arith.constant 0 : i32
    %c0_i32_0 = arith.constant 0 : i32
    %c0_i32_1 = arith.constant 0 : i32
    return %c0_i32, %c0_i32_0 : i32, i32
  }
  func.func @transform_9(%arg0: i32, %arg1: i32) -> (i32, i32) {
    %c0_i32 = arith.constant 0 : i32
    %c0_i32_0 = arith.constant 0 : i32
    %c0_i32_1 = arith.constant 0 : i32
    return %c0_i32, %c0_i32_0 : i32, i32
  }
  func.func @transform_10(%arg0: i32, %arg1: i32) -> (i32, i32) {
    %c0_i32 = arith.constant 0 : i32
    %c0_i32_0 = arith.constant 0 : i32
    %c0_i32_1 = arith.constant 0 : i32
    return %c0_i32, %c0_i32_0 : i32, i32
  }
  func.func @transform_11(%arg0: i32, %arg1: i32) -> (i32, i32) {
    %c0_i32 = arith.constant 0 : i32
    %c0_i32_0 = arith.constant 0 : i32
    %c0_i32_1 = arith.constant 0 : i32
    return %c0_i32, %c0_i32_0 : i32, i32
  }
  func.func @transform_12(%arg0: i32, %arg1: i32) -> (i32, i32, i32) {
    %c0_i32 = arith.constant 0 : i32
    %c0_i32_0 = arith.constant 0 : i32
    %c0_i32_1 = arith.constant 0 : i32
    return %arg0, %c0_i32, %c0_i32_0 : i32, i32, i32
  }
  func.func @transform_13(%arg0: i32, %arg1: i32) -> (i32, i32, i32) {
    %c0_i32 = arith.constant 0 : i32
    %c0_i32_0 = arith.constant 0 : i32
    %c0_i32_1 = arith.constant 0 : i32
    return %arg0, %c0_i32, %c0_i32_0 : i32, i32, i32
  }
  func.func @transform_14(%arg0: i32, %arg1: i32) -> (i32, i32, i32) {
    %c0_i32 = arith.constant 0 : i32
    %c0_i32_0 = arith.constant 0 : i32
    %c0_i32_1 = arith.constant 0 : i32
    return %arg0, %c0_i32, %c0_i32_0 : i32, i32, i32
  }
}

</mosaic_0001>

<bundles_post_ra>
// kernel: tpu_custom_call.1
= control target key start
LH: loop header
LB: loop body
LE: loop exit
PB: predicated region body
PF: predicated region fallthrough
CT: control target
= control target key end

     0   :  { %s4711_s0 = inlined_call_operand.vmem [shape: f32[2,3,2], index: 0, kind: input, shape index: {}]   ;;  %s4712_s1 = inlined_call_operand.vmem [shape: f32[2,3,512], index: 1, kind: input, shape index: {}]   ;;  %s4713_s2 = inlined_call_operand.vmem [shape: f32[2,3,512], index: 2, kind: input, shape index: {}]   ;;  %s4714_s3 = inlined_call_operand.vmem [shape: f32[1,1,512], index: 3, kind: input, shape index: {}]   ;;  %s4715_s4 = inlined_call_operand.vmem [shape: f32[2,1,4], index: 4, kind: input, shape index: {}]   ;;  %s4716_s5 = inlined_call_operand.vmem [shape: f32[2,1,32], index: 5, kind: input, shape index: {}]   ;;  %s4717_s6 = inlined_call_operand.vmem [shape: f32[2,8,32], index: 6, kind: input, shape index: {}]   ;;  %s4718_s7 = inlined_call_operand.vmem [shape: f32[3,512], index: 7, kind: input, shape index: {}]   ;;  %s4719_s8 = inlined_call_operand.vmem [shape: f32[1,10], index: 8, kind: input, shape index: {}]   ;;  %s4720_s9 = inlined_call_operand.<no memory space> [shape: f32[1,1], index: 9, kind: input, shape index: {}]   ;;  %s4721_s10 = inlined_call_operand.vmem [shape: f32[78,28], index: 10, kind: input, shape index: {}]   ;;  %s4722_s11 = inlined_call_operand.vmem [shape: f32[1,28], index: 11, kind: input, shape index: {}]   ;;  %s4723_s12 = inlined_call_operand.vmem [shape: f32[2,10,512], index: 12, kind: output, shape index: {0}]   ;;  %s4724_s13 = inlined_call_operand.hbm [shape: f32[2,1,512], index: 13, kind: output, shape index: {1}]   ;;  %s4725_s14 = inlined_call_operand.hbm [shape: f32[2,1,28], index: 14, kind: output, shape index: {2}]  }
   0x1   :  { %4730 = sst [smem:[#allocation12_spill]] %s4711_s0  ;;  %v20_v0 = vstv %s4720_s9 }
   0x2   :  { %4731 = sst [smem:[#allocation13_spill]] %s4712_s1  ;;  %21 = vst [vmem:[#allocation3] sm:$0x1] %v20_v0 }
   0x3   :  { %4732 = sst [smem:[#allocation14_spill]] %s4713_s2 }
   0x4   :  { %4733 = sst [smem:[#allocation15_spill]] %s4714_s3 }
   0x5   :  { %22 = vsyncpa [#allocation5], 0 }
   0x6   :  { %24 = vsyncpa [#allocation5 + $0x1], 0 }
   0x7   :  { %25 = vsyncpa [#allocation7], 0 }
   0x8   :  { %27 = vsyncpa [#allocation7 + $0x1], 0  ;;  %s3892_s15 = smov 0   ;;  %s3894_s16 = smov 0  }
   0x9   :  { %s3896_s17 = smov 0   ;;  %s3898_s18 = smov 0  }
   0xa   :  { %s3900_s19 = smov 0   ;;  %s3902_s20 = smov 0  }
   0xb LB: > { %4734 = sst [smem:[#allocation10_spill]] %s3791_s19  ;;  %s3370_s9 = sadd.s32 4294967295, %s3795_s20   ;;  %s3795_s20 = sphi %s3902_s20, %s33_s20   ;;  %s3791_s19 = sphi %s3900_s19, %s4754_s19   ;;  %s3787_s18 = sphi %s3898_s18, %s4753_s18   ;;  %s3783_s17 = sphi %s3896_s17, %s4757_s17   ;;  %s3779_s16 = sphi %s3894_s16, %s4756_s16   ;;  %s3775_s15 = sphi %s3892_s15, %s4755_s15  }
   0xc   : > { %s3371_s21 = sadd.s32 4294967294, %s3795_s20   ;;  %s45_s22 = sadd.s32 1, %s3791_s19 }
   0xd   : > { %s369_s23 = sadd.s32 1, %s3783_s17  ;;  %p47_p0 = scmp.ge.s32.totalorder %s45_s22, 2 }
   0xe   : > { %p379_p1 = scmp.ne.s32.totalorder %s3783_s17, %s3779_s16  ;;  %p380_p2 = scmp.eq.s32.totalorder %s3370_s9, 1 }
   0xf   : > { %p385_p3 = scmp.ne.s32.totalorder %s3779_s16, %s3775_s15  ;;  %s4759_s22 = smov (%p47_p0, %s45_s22), 0 }
  0x10   : > { %4735 = sst [smem:[#allocation11_spill]] %s4759_s22  ;;  %p3932_p4 = por %p380_p2, %p379_p1 }
  0x11   : > { %p386_p5 = scmp.eq.s32.totalorder %s3371_s21, 1  ;;  %s366_s25 = ssub.s32 %s3791_s19, %s4759_s22 }
  0x12   : > { %p3375_p6 = scmp.ge.s32.totalorder %s3795_s20, 1  ;;  %p367_p7 = scmp.eq.s32.totalorder %s366_s25, 0 }
  0x13   : > { %p3939_p8 = por %p386_p5, %p385_p3  ;;  %p505_p9 = scmp.lt.s32.totalorder %s3795_s20, 3 }
  0x14   : > { %s3945_s27 = scalar_select %p367_p7, %s3783_s17, %s369_s23  }
  0x15   : > { %p506_p10 = pnand %p3375_p6, %p505_p9 }
  0x16   : > { %p591_p11 = scmp.lt.s32.totalorder (!%p506_p10), %s3787_s18, 1  ;;  %v3797_v1 = vmov (!%p506_p10), 0   ;;  %v3798_v2 = vmov (!%p506_p10), 1   ;;  %s4738_s0 = sld [smem:[#allocation12_spill]] (!%p506_p10)  ;;  %v3800_v9 = vmov (!%p506_p10), 839922192   ;;  %v669_v11 = vlaneseq (!%p506_p10) }
  0x17   : > { %509 = sbr.rel (%p506_p10) target bundleno = 1246 (0x4de), region = 68  ;;  %3666 = vset.pattern.permute.xlu0 (!%p506_p10), %v3797_v1  ;;  %3667 = vset.pattern.permute.xlu1 (!%p506_p10), %v3798_v2  ;;  %s3799_s23 = smov (!%p506_p10), 1   ;;  %v667_v10 = vunpack.c.l.s4 (!%p506_p10), %v3800_v9  ;;  %vm4727_vm0 = vcmask (!%p506_p10), 1042432   ;;  %v3801_v34 = vmov (!%p506_p10), 1966171168   ;;  %vm4726_vm1 = vcmask (!%p506_p10), 1045504  }
  0x18   : > { %v3956_v13 = vshrl.u32 (!%p506_p10), %v669_v11, 7  ;;  %s4739_s1 = sld [smem:[#allocation13_spill]] (!%p506_p10)  ;;  %s4740_s2 = sld [smem:[#allocation14_spill]] (!%p506_p10)  ;;  %v945_v35 = vunpack.c.l.s4 (!%p506_p10), %v3801_v34 }
  0x19   : > { %v668_v12 = vunpack.c.0.s8 (!%p506_p10), %v667_v10  ;;  %s4741_s3 = sld [smem:[#allocation15_spill]] (!%p506_p10)  ;;  %s4623_s19 = sand.u32 (!%p506_p10), 1, %s3779_s16  }
  0x1a   : > { %v3979_v26 = vsub.s32 (!%p506_p10), 0, %v3956_v13  ;;  %v3982_v27 = vsub.s32 (!%p506_p10), 2, %v3956_v13  ;;  %v3985_v38 = vsub.s32 (!%p506_p10), 1, %v3956_v13  ;;  %v3990_v41 = vsub.s32 (!%p506_p10), 3, %v3956_v13 }
  0x1b   : > { %v3960_v14 = vsub.s32 (!%p506_p10), %v668_v12, %v3956_v13  ;;  %v946_v50 = vunpack.c.0.s8 (!%p506_p10), %v945_v35  ;;  %v714_v53 = vsub.s32 (!%p506_p10), 4, %v3956_v13  ;;  %v765_v54 = vsub.s32 (!%p506_p10), 5, %v3956_v13 }
  0x1d   : > { %v4015_v63 = vsub.s32 (!%p506_p10), %v946_v50, %v3956_v13 }
  0x1e   : > { %s3949_s28 = scalar_select %p591_p11, %s3787_s18, 1 }
  0x1f   : > { %v3976_v25 = vld [vmem:[%s4741_s3] sm:$0xf]  ;;  %s3806_s3 = smov 10  }
  0x20   : > { %s3377_s29 = sshll.u32 %s3949_s28, 2  ;;  %s3479_s25 = sshll.u32 %s3949_s28, 4  ;;  %v909_v40 = vrot.slane %v3976_v25, %v3979_v26  ;;  %v917_v43 = vrot.slane %v3976_v25, %v3982_v27  ;;  %v913_v55 = vrot.slane %v3976_v25, %v3985_v38  ;;  %v921_v58 = vrot.slane %v3976_v25, %v3990_v41 }
  0x21   : > { %s594_s21 = scalar_lea.vmem %s4738_s0, %s3377_s29  ;;  %s603_s9 = scalar_lea.vmem %s4739_s1, %s3479_s25 }
  0x22   : > { %v647_v3 = vld [vmem:[%s594_s21] sm:$0x7]  ;;  %v658_v18 = vld [vmem:[%s603_s9 + $0x8] sm:$0x77]  ;;  %s613_s0 = scalar_lea.vmem %s4740_s2, %s3479_s25  ;;  %s625_s21 = scalar_lea.vmem %s4716_s5, %s3949_s28 }
  0x23   : > { %649 = vrot.lane.b32.xlu0 %v647_v3, %s3799_s23  ;;  %v657_v17 = vld [vmem:[%s603_s9] sm:$0x77]  ;;  %v660_v23 = vld [vmem:[%s613_s0 + $0x8] sm:$0x77]  ;;  %v890_v42 = vcombine.high %v658_v18, %v658_v18  ;;  %s622_s30 = scalar_lea.vmem %s4715_s4, %s3949_s28  ;;  %s3805_s1 = smov 14  }
  0x24   : > { %v659_v22 = vld [vmem:[%s613_s0] sm:$0x77]  ;;  %v896_v31 = vcombine.high %v660_v23, %v660_v23  ;;  %v899_v33 = vrot.slane %v660_v23, 5  ;;  %v889_v39 = vcombine.high %v657_v17, %v657_v17  ;;  %s3804_s0 = smov 64   ;;  %s3382_s2 = sshll.u32 %s3949_s28, 3 }
  0x25   : > { %v895_v30 = vcombine.high %v659_v22, %v659_v22  ;;  %v897_v32 = vrot.slane %v659_v22, 5  ;;  %s3812_s9 = smov [#allocation4]  }
  0x26   : > { %v900_v47 = vrot.slane %v896_v31, 5  ;;  %v929_v49 = vsel %vm4727_vm0, %v658_v18, %v899_v33 }
  0x27   : > { %663 = vperm.xlu0 %3666, %v647_v3   ;;  %v898_v46 = vrot.slane %v895_v30, 5  ;;  %v927_v48 = vsel %vm4727_vm0, %v657_v17, %v897_v32  ;;  %v4009_v61 = vsel %vm4726_vm1, %v929_v49, %v917_v43  ;;  %v3802_v32 = vmov 0.0  }
  0x28   : > { %v4006_v60 = vsel %vm4726_vm1, %v927_v48, %v909_v40  ;;  %v4012_v62 = vsel %vm4727_vm0, %v890_v42, %v900_v47 }
  0x29   : > { %v4003_v59 = vsel %vm4727_vm0, %v889_v39, %v898_v46 }
  0x2b   : > { %3668 = vset.pattern.permute.xlu0 %v3798_v2  ;;  %v4018_v2 = vadd.s32 8, %v3956_v13 }
  0x95   : > { %v650_v4 = vpop.permute.xlu0 %649 }
  0x96   : > { %v652_v5 = vsub.f32 %v647_v3, %v650_v4  ;;  %v4021_v3 = vadd.s32 16, %v3956_v13  ;;  %v4024_v4 = vadd.s32 24, %v3956_v13 }
  0x98   : > { %v653_v6 = vmul.f32 0.125, %v652_v5 }
  0x9a   : > { %v654_v7 = vadd.f32 1e-12, %v653_v6  ;;  %2599 = vperm.xlu0 %3668, %v653_v6  }
  0x9c   : > { %3675 = vrcp.f32 %v654_v7 }
  0x9e   : > { %3670 = vset.pattern.permute.xlu0 %v3797_v1 }
  0xa6   : > { %v3676_v8 = vpop.eup %3675  ;;  %v3965_v15 = vpop.permute.xlu0 %663 }
  0xa7   : > { %678 = vperm.xlu1 %3667, %v3676_v8   ;;  %v672_v16 = vrot.slane %v3965_v15, %v3960_v14 }
  0xa9   : > { %v674_v19 = vsub.f32 %v657_v17, %v672_v16  ;;  %v675_v20 = vsub.f32 %v658_v18, %v672_v16 }
  0xab   : > { %3669 = vset.pattern.permute.xlu1 %v3797_v1 }
 0x126   : > { %v679_v21 = vpop.permute.xlu1 %678 }
 0x127   : > { %v686_v24 = vrot.slane %v679_v21, %v3960_v14 }
 0x129   : > { %v688_v28 = vmul.f32 %v686_v24, %v674_v19  ;;  %v689_v29 = vmul.f32 %v686_v24, %v675_v20  ;;  %v4029_v19 = vadd.s32 32, %v3956_v13  ;;  %v4032_v20 = vadd.s32 40, %v3956_v13 }
 0x12b   : > { %v690_v36 = vfloor.f32 %v688_v28  ;;  %v691_v37 = vfloor.f32 %v689_v29 }
 0x12d   : > { %v692_v44 = vmax.f32 %v690_v36, 0.0  ;;  %v693_v45 = vmax.f32 %v691_v37, 0.0 }
 0x12f   : > { %v694_v51 = vmin.f32 %v692_v44, 7.0  ;;  %v695_v52 = vmin.f32 %v693_v45, 7.0 }
 0x131   : > { %v3587_v56 = vtrunc.f32 %v694_v51  ;;  %v3589_v57 = vtrunc.f32 %v695_v52  ;;  %v3803_v51 = vmov 1.0|1.0  }
 0x133   : > { %v3588_v0 = vcvt.f32.s32 %v3587_v56  ;;  %v3590_v1 = vcvt.f32.s32 %v3589_v57  ;;  %v4096_v57 = vsel %vm4726_vm1, %v4003_v59, %v913_v55 }
 0x135   : > { %v698_v5 = vmul.u32 8, %v3588_v0  ;;  %v699_v6 = vmul.u32 8, %v3590_v1  ;;  %v3385_v7 = vrot.slane %v3588_v0, 9  ;;  %v3386_v8 = vrot.slane %v3590_v1, 9 }
 0x136   : > { %v711_v9 = vrot.slane %v3588_v0, %v3979_v26  ;;  %v715_v10 = vrot.slane %v3588_v0, %v714_v53  ;;  %v719_v12 = vrot.slane %v3590_v1, %v3979_v26  ;;  %v723_v16 = vrot.slane %v3590_v1, %v714_v53 }
 0x137   : > { %v704_v17 = vadd.s32 %v3385_v7, %v698_v5  ;;  %v705_v18 = vadd.s32 %v3386_v8, %v699_v6  ;;  %v4103_v0 = vsel %vm4726_vm1, %v4012_v62, %v921_v58  ;;  %v4107_v1 = vadd.s32 48, %v3956_v13 }
 0x138   : > { %v727_v21 = vrot.slane %v711_v9, %v3979_v26  ;;  %v731_v22 = vrot.slane %v715_v10, %v3979_v26  ;;  %v735_v23 = vrot.slane %v719_v12, %v3979_v26  ;;  %v739_v24 = vrot.slane %v723_v16, %v3979_v26 }
 0x139   : > { %v762_v28 = vrot.slane %v704_v17, %v3985_v38  ;;  %v766_v29 = vrot.slane %v704_v17, %v765_v54  ;;  %v770_v30 = vrot.slane %v705_v18, %v3985_v38  ;;  %v774_v31 = vrot.slane %v705_v18, %v765_v54 }
 0x13a   : > { %vm740_vm2 = vcmp.eq.s32.totalorder %v3956_v13, %v727_v21  ;;  %vm741_vm3 = vcmp.eq.s32.totalorder %v3956_v13, %v731_v22  ;;  %vm742_vm4 = vcmp.eq.s32.totalorder %v3956_v13, %v735_v23  ;;  %vm743_vm5 = vcmp.eq.s32.totalorder %v3956_v13, %v739_v24 }
 0x13b   : > { %v3387_v33 = vsel %vm740_vm2, 1.0, %v3802_v32  ;;  %v3388_v34 = vsel %vm741_vm3, 1.0, %v3802_v32  ;;  %v3389_v35 = vsel %vm742_vm4, 1.0, %v3802_v32  ;;  %v3390_v36 = vsel %vm743_vm5, 1.0, %v3802_v32 }
 0x13c   : > { %v4049_v37 = vrot.slane %v762_v28, %v3985_v38  ;;  %v4052_v39 = vrot.slane %v766_v29, %v3985_v38  ;;  %v4055_v40 = vrot.slane %v770_v30, %v3985_v38  ;;  %v4058_v42 = vrot.slane %v774_v31, %v3985_v38 }
 0x13d   : > { %v940_v43 = vcombine.low %v3387_v33, %v3388_v34  ;;  %v941_v44 = vcombine.high %v3387_v33, %v3388_v34  ;;  %v942_v45 = vcombine.low %v3389_v35, %v3390_v36  ;;  %v943_v46 = vcombine.high %v3389_v35, %v3390_v36 }
 0x13e   : > { %vm792_vm6 = vcmp.eq.s32.totalorder %v3956_v13, %v4052_v39  ;;  %vm796_vm7 = vcmp.eq.s32.totalorder %v4018_v2, %v4052_v39  ;;  %vm794_vm8 = vcmp.eq.s32.totalorder %v3956_v13, %v4058_v42  ;;  %vm798_vm9 = vcmp.eq.s32.totalorder %v4018_v2, %v4058_v42 }
 0x13f   : > { %v950_v47 = vrot.slane %v940_v43, %v4015_v63  ;;  %v957_v48 = vrot.slane %v941_v44, %v4015_v63  ;;  %v964_v49 = vrot.slane %v942_v45, %v4015_v63  ;;  %v971_v50 = vrot.slane %v943_v46, %v4015_v63  ;;  %vm3517_vm10 = vmpackc.low %vm796_vm7, %vm792_vm6 }
 0x140   : > { %3518 = vmatprep.subr.msk.bf16.mxu0 %vm3517_vm10, %v3803_v51  ;;  %vm3533_vm11 = vmpackc.low %vm798_vm9, %vm794_vm8  ;;  %vm791_vm12 = vcmp.eq.s32.totalorder %v3956_v13, %v4049_v37  ;;  %vm795_vm13 = vcmp.eq.s32.totalorder %v4018_v2, %v4049_v37  ;;  %vm793_vm14 = vcmp.eq.s32.totalorder %v3956_v13, %v4055_v40  ;;  %vm797_vm15 = vcmp.eq.s32.totalorder %v4018_v2, %v4055_v40 }
 0x141   : > { %v972_v52 = vcombine.low %v950_v47, %v964_v49  ;;  %v973_v53 = vcombine.high %v950_v47, %v964_v49  ;;  %v974_v54 = vcombine.low %v957_v48, %v971_v50  ;;  %v975_v56 = vcombine.high %v957_v48, %v971_v50  ;;  %3534 = vmatprep.subr.msk.bf16.mxu1 %vm3533_vm11, %v3803_v51  ;;  %vm3519_vm2 = vmpackc.low %vm795_vm13, %vm791_vm12 }
 0x142   : > { %3520 = vmatpush1.bf16.xpose.msk.msra.mxu0 %vm3519_vm2, %v3803_v51  ;;  %vm3535_vm3 = vmpackc.low %vm797_vm15, %vm793_vm14  ;;  %vm800_vm4 = vcmp.eq.s32.totalorder %v4021_v3, %v4052_v39  ;;  %vm804_vm5 = vcmp.eq.s32.totalorder %v4024_v4, %v4052_v39  ;;  %vm802_vm6 = vcmp.eq.s32.totalorder %v4021_v3, %v4058_v42  ;;  %vm806_vm7 = vcmp.eq.s32.totalorder %v4024_v4, %v4058_v42 }
 0x143   : > { %3536 = vmatpush1.bf16.xpose.msk.msra.mxu1 %vm3535_vm3, %v3803_v51  ;;  %vm3521_vm8 = vmpackc.low %vm804_vm5, %vm800_vm4  ;;  %v4110_v2 = vadd.s32 56, %v3956_v13  ;;  %v982_v5 = vrot.slane %v972_v52, %v4015_v63  ;;  %v4114_v55 = vrot.slane %v974_v54, %v4015_v63  ;;  %v4117_v25 = vrot.slane %v973_v53, %v4015_v63 }
 0x144   : > { %v4120_v58 = vrot.slane %v975_v56, %v4015_v63  ;;  %3522 = vmatprep.subr.msk.bf16.mxu0 %vm3521_vm8, %v3803_v51  ;;  %vm3537_vm9 = vmpackc.low %vm806_vm7, %vm802_vm6  ;;  %vm799_vm10 = vcmp.eq.s32.totalorder %v4021_v3, %v4049_v37  ;;  %vm803_vm11 = vcmp.eq.s32.totalorder %v4024_v4, %v4049_v37  ;;  %vm801_vm12 = vcmp.eq.s32.totalorder %v4021_v3, %v4055_v40 }
 0x145   : > { %3538 = vmatprep.subr.msk.bf16.mxu1 %vm3537_vm9, %v3803_v51  ;;  %vm805_vm13 = vcmp.eq.s32.totalorder %v4024_v4, %v4055_v40  ;;  %vm808_vm14 = vcmp.eq.s32.totalorder %v4029_v19, %v4052_v39  ;;  %vm812_vm15 = vcmp.eq.s32.totalorder %v4032_v20, %v4052_v39  ;;  %vm810_vm2 = vcmp.eq.s32.totalorder %v4029_v19, %v4058_v42  ;;  %vm3523_vm8 = vmpackc.low %vm803_vm11, %vm799_vm10 }
 0x146   : > { %vm814_vm3 = vcmp.eq.s32.totalorder %v4032_v20, %v4058_v42  ;;  %vm811_vm5 = vcmp.eq.s32.totalorder %v4032_v20, %v4049_v37  ;;  %vm813_vm7 = vcmp.eq.s32.totalorder %v4032_v20, %v4055_v40  ;;  %vm816_vm9 = vcmp.eq.s32.totalorder %v4107_v1, %v4052_v39  ;;  %vm3539_vm6 = vmpackc.low %vm805_vm13, %vm801_vm12 }
 0x147   : > { %vm820_vm1 = vcmp.eq.s32.totalorder %v4110_v2, %v4052_v39  ;;  %vm818_vm0 = vcmp.eq.s32.totalorder %v4107_v1, %v4058_v42  ;;  %vm822_vm4 = vcmp.eq.s32.totalorder %v4110_v2, %v4058_v42  ;;  %v1011_v59 = vrot.slane %v982_v5, %v3979_v26  ;;  %vm3525_vm10 = vmpackc.low %vm812_vm15, %vm808_vm14 }
 0x148   : > { %v1015_v62 = vrot.slane %v982_v5, %v3985_v38  ;;  %v1019_v4 = vrot.slane %v982_v5, %v3982_v27  ;;  %v1023_v6 = vrot.slane %v982_v5, %v3990_v41  ;;  %v1027_v3 = vrot.slane %v4117_v25, %v3979_v26  ;;  %vm3541_vm11 = vmpackc.low %vm814_vm3, %vm810_vm2 }
 0x149   : > { %v1031_v7 = vrot.slane %v4117_v25, %v3985_v38  ;;  %v1035_v8 = vrot.slane %v4117_v25, %v3982_v27  ;;  %v1039_v9 = vrot.slane %v4117_v25, %v3990_v41  ;;  %v1168_v10 = vmul.f32 %v1011_v59, %v4006_v60 }
 0x14a   : > { %3524 = vmatpush1.bf16.xpose.msk.msra.mxu0 %vm3523_vm8, %v3803_v51  ;;  %v1169_v12 = vmul.f32 %v1015_v62, %v4096_v57  ;;  %v1170_v16 = vmul.f32 %v1019_v4, %v4009_v61  ;;  %v1171_v17 = vmul.f32 %v1023_v6, %v4103_v0  ;;  %v1172_v18 = vmul.f32 %v1027_v3, %v4006_v60 }
 0x14b   : > { %3540 = vmatpush1.bf16.xpose.msk.msra.mxu1 %vm3539_vm6, %v3803_v51  ;;  %3526 = vmatprep.subr.msk.bf16.mxu0 %vm3525_vm10, %v3803_v51  ;;  %v1173_v21 = vmul.f32 %v1031_v7, %v4096_v57  ;;  %v1174_v22 = vmul.f32 %v1035_v8, %v4009_v61  ;;  %v1175_v23 = vmul.f32 %v1039_v9, %v4103_v0  ;;  %vm4744_vm10 = vcmask 1042432  }
 0x14c   : > { %3542 = vmatprep.subr.msk.bf16.mxu1 %vm3541_vm11, %v3803_v51  ;;  %v1232_v24 = vcombine.low %v1168_v10, %v1169_v12  ;;  %v1233_v28 = vcombine.high %v1168_v10, %v1169_v12  ;;  %v1004_v29 = vcombine.high %v982_v5, %v982_v5  ;;  %vm815_vm12 = vcmp.eq.s32.totalorder %v4107_v1, %v4049_v37 }
 0x14d   : > { %vm819_vm13 = vcmp.eq.s32.totalorder %v4110_v2, %v4049_v37  ;;  %v1234_v30 = vcombine.low %v1170_v16, %v1171_v17  ;;  %v1235_v31 = vcombine.high %v1170_v16, %v1171_v17  ;;  %v1299_v33 = vcombine.low %v1172_v18, %v1173_v21 }
 0x14e   : > { %v1300_v34 = vcombine.high %v1172_v18, %v1173_v21  ;;  %vm817_vm14 = vcmp.eq.s32.totalorder %v4107_v1, %v4055_v40  ;;  %vm821_vm15 = vcmp.eq.s32.totalorder %v4110_v2, %v4055_v40  ;;  %v1242_v35 = vrot.slane %v1232_v24, %v4015_v63 }
 0x14f   : > { %v1249_v36 = vrot.slane %v1233_v28, %v4015_v63  ;;  %v1301_v43 = vcombine.low %v1174_v22, %v1175_v23  ;;  %v1043_v44 = vrot.slane %v1004_v29, %v3979_v26  ;;  %vm4742_vm2 = vcmp.eq.s32.totalorder %v4029_v19, %v4049_v37 }
 0x150   : > { %vm3527_vm3 = vmpackc.low %vm811_vm5, %vm4742_vm2  ;;  %v1256_v45 = vrot.slane %v1234_v30, %v4015_v63  ;;  %v1263_v46 = vrot.slane %v1235_v31, %v4015_v63  ;;  %v1309_v47 = vrot.slane %v1299_v33, %v4015_v63  ;;  %v1047_v48 = vrot.slane %v1004_v29, %v3985_v38 }
 0x151   : > { %vm4743_vm6 = vcmp.eq.s32.totalorder %v4029_v19, %v4055_v40  ;;  %v1323_v49 = vrot.slane %v1301_v43, %v4015_v63  ;;  %v1051_v50 = vrot.slane %v1004_v29, %v3982_v27  ;;  %v1055_v52 = vrot.slane %v1004_v29, %v3990_v41  ;;  %vm3529_vm5 = vmpackc.low %vm820_vm1, %vm816_vm9 }
 0x152   : > { %vm3543_vm8 = vmpackc.low %vm813_vm7, %vm4743_vm6  ;;  %v4226_v53 = vmul.f32 %v1043_v44, %v4006_v60  ;;  %3528 = vmatpush1.bf16.xpose.msk.msra.mxu0 %vm3527_vm3, %v3803_v51  ;;  %v1264_v19 = vcombine.low %v1242_v35, %v1256_v45  ;;  %v1265_v20 = vcombine.high %v1242_v35, %v1256_v45  ;;  %v1266_v54 = vcombine.low %v1249_v36, %v1263_v46 }
 0x153   : > { %v1267_v56 = vcombine.high %v1249_v36, %v1263_v46  ;;  %3544 = vmatpush1.bf16.xpose.msk.msra.mxu1 %vm3543_vm8, %v3803_v51  ;;  %3530 = vmatprep.subr.msk.bf16.mxu0 %vm3529_vm5, %v3803_v51  ;;  %vm3545_vm7 = vmpackc.low %vm822_vm4, %vm818_vm0  ;;  %v1331_v5 = vcombine.low %v1309_v47, %v1323_v49  ;;  %v4244_v59 = vmul.f32 %v1047_v48, %v4096_v57  ;;  %vm639_vm4 = vcmask 523264  }
 0x154   : > { %v4247_v39 = vmul.f32 %v1051_v50, %v4009_v61  ;;  %3546 = vmatprep.subr.msk.bf16.mxu1 %vm3545_vm7, %v3803_v51  ;;  %v1274_v62 = vrot.slane %v1264_v19, %v4015_v63  ;;  %v1281_v4 = vrot.slane %v1266_v54, %v4015_v63  ;;  %v1288_v6 = vrot.slane %v1265_v20, %v4015_v63  ;;  %vm3531_vm0 = vmpackc.low %vm819_vm13, %vm815_vm12 }
 0x155   : > { %v1295_v3 = vrot.slane %v1267_v56, %v4015_v63  ;;  %v1341_v42 = vrot.slane %v1331_v5, %v4015_v63  ;;  %v4256_v7 = vmul.f32 %v1055_v52, %v4103_v0  ;;  %v1302_v8 = vcombine.high %v1174_v22, %v1175_v23  ;;  %vm3547_vm1 = vmpackc.low %vm821_vm15, %vm817_vm14  ;;  %640 = vst.msk [vmem:[#allocation2] sm:$0xff] %vm639_vm4, %v3802_v32 }
 0x156   : > { %v1316_v9 = vrot.slane %v1300_v34, %v4015_v63  ;;  %v1297_v10 = vcombine.high %v1281_v4, %v1281_v4  ;;  %v1775_v12 = vcombine.low %v1274_v62, %v1288_v6  ;;  %v3423_v16 = vcombine.high %v1274_v62, %v1288_v6  ;;  %641 = vst.msk [vmem:[#allocation2 + $0x8] sm:$0xff] %vm639_vm4, %v3802_v32 }
 0x157   : > { %v1777_v17 = vcombine.low %v1281_v4, %v1295_v3  ;;  %v1363_v18 = vcombine.high %v1341_v42, %v1341_v42  ;;  %v1330_v21 = vrot.slane %v1302_v8, %v4015_v63  ;;  %v1332_v24 = vcombine.high %v1309_v47, %v1323_v49  ;;  %642 = vst.msk [vmem:[#allocation2 + $0x10] sm:$0xff] %vm639_vm4, %v3802_v32 }
 0x158   : > { %v1366_v28 = vcombine.low %v4226_v53, %v4244_v59  ;;  %v1778_v29 = vcombine.low %v1297_v10, %v1341_v42  ;;  %v1785_v30 = vrot.slane %v1775_v12, %v4015_v63  ;;  %v1792_v31 = vrot.slane %v3423_v16, %v4015_v63  ;;  %643 = vst.msk [vmem:[#allocation2 + $0x18] sm:$0xff] %vm639_vm4, %v3802_v32 }
 0x159   : > { %v1799_v22 = vrot.slane %v1777_v17, %v4015_v63  ;;  %v1333_v23 = vcombine.low %v1316_v9, %v1330_v21  ;;  %v1334_v33 = vcombine.high %v1316_v9, %v1330_v21  ;;  %v1355_v34 = vrot.slane %v1332_v24, %v4015_v63  ;;  %644 = vst.msk [vmem:[#allocation2 + $0x20] sm:$0xff] %vm639_vm4, %v3802_v32 }
 0x15a   : > { %v1368_v35 = vcombine.low %v4247_v39, %v4256_v7  ;;  %3532 = vmatpush1.bf16.xpose.msk.msra.mxu0 %vm3531_vm0, %v3803_v51  ;;  %v1806_v36 = vrot.slane %v1778_v29, %v4015_v63  ;;  %v1808_v37 = vcombine.high %v1785_v30, %v1792_v31  ;;  %v1807_v43 = vcombine.low %v1785_v30, %v1792_v31 }
 0x15b   : > { %v1376_v44 = vrot.slane %v1366_v28, %v4015_v63  ;;  %3548 = vmatpush1.bf16.xpose.msk.msra.mxu1 %vm3547_vm1, %v3803_v51  ;;  %v1348_v45 = vrot.slane %v1333_v23, %v4015_v63  ;;  %v1362_v46 = vrot.slane %v1334_v33, %v4015_v63  ;;  %v1365_v47 = vcombine.high %v1355_v34, %v1355_v34 }
 0x15c   : > { %v1390_v48 = vrot.slane %v1368_v35, %v4015_v63  ;;  %v1810_v1 = vcombine.high %v1799_v22, %v1806_v36  ;;  %v1824_v49 = vrot.slane %v1808_v37, %v4015_v63  ;;  %v1809_v40 = vcombine.low %v1799_v22, %v1806_v36  ;;  %645 = vst.msk [vmem:[#allocation2 + $0x28] sm:$0xff] %vm639_vm4, %v3802_v32 }
 0x15d   : > { %v1817_v2 = vrot.slane %v1807_v43, %v4015_v63  ;;  %v1364_v50 = vcombine.high %v1348_v45, %v1348_v45  ;;  %v1843_v20 = vcombine.low %v1355_v34, %v1363_v18  ;;  %v1844_v56 = vcombine.low %v1365_v47, %v1348_v45  ;;  %646 = vst.msk [vmem:[#allocation2 + $0x30] sm:$0xff] %vm639_vm4, %v3802_v32 }
 0x15e   : > { %v1398_v52 = vcombine.low %v1376_v44, %v1390_v48  ;;  %v1399_v19 = vcombine.high %v1376_v44, %v1390_v48  ;;  %v1838_v54 = vrot.slane %v1810_v1, %v4015_v63  ;;  %v1831_v51 = vrot.slane %v1809_v40, %v4015_v63 }
 0x15f   : > { %v1006_v5 = vcombine.high %v4117_v25, %v4117_v25  ;;  %v1845_v6 = vcombine.low %v1362_v46, %v1364_v50  ;;  %v1853_v3 = vrot.slane %v1843_v20, %v4015_v63  ;;  %v1860_v16 = vrot.slane %v1844_v56, %v4015_v63 }
 0x160   : > { %v1408_v62 = vrot.slane %v1398_v52, %v4015_v63  ;;  %v1422_v4 = vrot.slane %v1399_v19, %v4015_v63  ;;  %v1841_v42 = vcombine.low %v1824_v49, %v1838_v54  ;;  %v1842_v8 = vcombine.high %v1824_v49, %v1838_v54 }
 0x161   : > { %v1839_v9 = vcombine.low %v1817_v2, %v1831_v51  ;;  %v1840_v10 = vcombine.high %v1817_v2, %v1831_v51  ;;  %v1867_v17 = vrot.slane %v1845_v6, %v4015_v63  ;;  %v1059_v18 = vrot.slane %v1006_v5, %v3979_v26 }
 0x162   : > { %v1846_v12 = vcombine.low %v1408_v62, %v1422_v4  ;;  %2343 = vmatprep.mubr.f32.mxu0 %v1841_v42  ;;  %2443 = vmatprep.mubr.f32.mxu1 %v1842_v8  ;;  %v1063_v25 = vrot.slane %v1006_v5, %v3985_v38  ;;  %v1067_v21 = vrot.slane %v1006_v5, %v3982_v27  ;;  %vm2514_vm9 = vcmask 1041408  }
 0x163   : > { %v1071_v24 = vrot.slane %v1006_v5, %v3990_v41  ;;  %2344 = vmatmul.mubr.f32.vlgmr.msra.gmra.mrb[0].mxu0 %v1839_v9  ;;  %2444 = vmatmul.mubr.f32.vlgmr.msra.gmra.mrb[0].mxu1 %v1840_v10  ;;  %v1876_v29 = vcombine.high %v1853_v3, %v1860_v16  ;;  %v1875_v30 = vcombine.low %v1853_v3, %v1860_v16  ;;  %vm2506_vm11 = vcmask 1040384  }
 0x164   : > { %v1874_v28 = vrot.slane %v1846_v12, %v4015_v63  ;;  %v1180_v31 = vmul.f32 %v1059_v18, %v4006_v60  ;;  %v1181_v22 = vmul.f32 %v1063_v25, %v4096_v57  ;;  %v1182_v23 = vmul.f32 %v1067_v21, %v4009_v61 }
 0x165   : > { %v1183_v33 = vmul.f32 %v1071_v24, %v4103_v0  ;;  %v1892_v35 = vrot.slane %v1876_v29, %v4015_v63  ;;  %v1885_v37 = vrot.slane %v1875_v30, %v4015_v63  ;;  %v1367_v43 = vcombine.high %v4226_v53, %v4244_v59 }
 0x166   : > { %v1878_v34 = vcombine.high %v1867_v17, %v1874_v28  ;;  %v1877_v36 = vcombine.low %v1867_v17, %v1874_v28  ;;  %v1369_v44 = vcombine.high %v4247_v39, %v4256_v7  ;;  %v1433_v45 = vcombine.low %v1180_v31, %v1181_v22 }
 0x167   : > { %v1435_v46 = vcombine.low %v1182_v23, %v1183_v33  ;;  %v3424_v1 = vcombine.high %v1408_v62, %v1422_v4  ;;  %v1075_v49 = vrot.slane %v4114_v55, %v3979_v26  ;;  %v1383_v40 = vrot.slane %v1367_v43, %v4015_v63 }
 0x168   : > { %v1906_v47 = vrot.slane %v1878_v34, %v4015_v63  ;;  %v1899_v48 = vrot.slane %v1877_v36, %v4015_v63  ;;  %v1397_v2 = vrot.slane %v1369_v44, %v4015_v63  ;;  %v1443_v50 = vrot.slane %v1433_v45, %v4015_v63 }
 0x169   : > { %v1457_v53 = vrot.slane %v1435_v46, %v4015_v63  ;;  %v1921_v56 = vrot.slane %v3424_v1, %v4015_v63  ;;  %v1079_v5 = vrot.slane %v4114_v55, %v3985_v38  ;;  %v1083_v62 = vrot.slane %v4114_v55, %v3982_v27 }
 0x16a   : > { %v1909_v59 = vcombine.low %v1892_v35, %v1906_v47  ;;  %v1910_v39 = vcombine.high %v1892_v35, %v1906_v47  ;;  %v1907_v7 = vcombine.low %v1885_v37, %v1899_v48  ;;  %v1908_v52 = vcombine.high %v1885_v37, %v1899_v48 }
 0x16b   : > { %v1400_v19 = vcombine.low %v1383_v40, %v1397_v2  ;;  %v1401_v20 = vcombine.high %v1383_v40, %v1397_v2  ;;  %v1465_v54 = vcombine.low %v1443_v50, %v1457_v53  ;;  %v1466_v51 = vcombine.high %v1443_v50, %v1457_v53 }
 0x16c   : > { %2348 = vmatprep.mubr.f32.mxu0 %v1909_v59  ;;  %2448 = vmatprep.mubr.f32.mxu1 %v1910_v39  ;;  %v1087_v8 = vrot.slane %v4114_v55, %v3990_v41  ;;  %v4333_v9 = vmul.f32 %v1075_v49, %v4006_v60  ;;  %v4336_v10 = vmul.f32 %v1079_v5, %v4096_v57  ;;  %vm2527_vm12 = vcmask 1043456  }
 0x16d   : > { %2349 = vmatmul.mubr.f32.gmra.mrb[2].mxu0 %v1907_v7  ;;  %2449 = vmatmul.mubr.f32.gmra.mrb[2].mxu1 %v1908_v52  ;;  %v1415_v4 = vrot.slane %v1400_v19, %v4015_v63  ;;  %v1429_v6 = vrot.slane %v1401_v20, %v4015_v63  ;;  %v1475_v3 = vrot.slane %v1465_v54, %v4015_v63  ;;  %vm2533_vm13 = vcmask 1044480  }
 0x16e   : > { %v1489_v42 = vrot.slane %v1466_v51, %v4015_v63  ;;  %v4339_v18 = vmul.f32 %v1083_v62, %v4009_v61  ;;  %v4342_v25 = vmul.f32 %v1087_v8, %v4103_v0  ;;  %v1434_v21 = vcombine.high %v1180_v31, %v1181_v22 }
 0x16f   : > { %v1431_v12 = vcombine.high %v1415_v4, %v1415_v4  ;;  %v1497_v16 = vcombine.high %v1475_v3, %v1475_v3  ;;  %v1912_v17 = vcombine.low %v1415_v4, %v1429_v6  ;;  %v1436_v24 = vcombine.high %v1182_v23, %v1183_v33 }
 0x170   : > { %v1499_v28 = vcombine.high %v1489_v42, %v1489_v42  ;;  %v1500_v35 = vcombine.low %v4333_v9, %v4336_v10  ;;  %v1450_v36 = vrot.slane %v1434_v21, %v4015_v63  ;;  %v1502_v43 = vcombine.low %v4339_v18, %v4342_v25 }
 0x171   : > { %v1913_v29 = vcombine.low %v1431_v12, %v1475_v3  ;;  %v1914_v30 = vcombine.low %v1489_v42, %v1497_v16  ;;  %v1928_v34 = vrot.slane %v1912_v17, %v4015_v63  ;;  %v1464_v37 = vrot.slane %v1436_v24, %v4015_v63 }
 0x172   : > { %v1091_v44 = vrot.slane %v4120_v58, %v3979_v26  ;;  %v1510_v47 = vrot.slane %v1500_v35, %v4015_v63  ;;  %v1524_v48 = vrot.slane %v1502_v43, %v4015_v63  ;;  %v1095_v19 = vrot.slane %v4120_v58, %v3985_v38 }
 0x173   : > { %v1935_v31 = vrot.slane %v1913_v29, %v4015_v63  ;;  %v1942_v22 = vrot.slane %v1914_v30, %v4015_v63  ;;  %v1944_v23 = vcombine.high %v1921_v56, %v1928_v34  ;;  %v1943_v33 = vcombine.low %v1921_v56, %v1928_v34 }
 0x174   : > { %v1467_v45 = vcombine.low %v1450_v36, %v1464_v37  ;;  %v1468_v46 = vcombine.high %v1450_v36, %v1464_v37  ;;  %v1532_v59 = vcombine.low %v1510_v47, %v1524_v48  ;;  %v1533_v39 = vcombine.high %v1510_v47, %v1524_v48 }
 0x175   : > { %v1946_v1 = vcombine.high %v1935_v31, %v1942_v22  ;;  %v1960_v49 = vrot.slane %v1944_v23, %v4015_v63  ;;  %v1945_v40 = vcombine.low %v1935_v31, %v1942_v22  ;;  %v1953_v2 = vrot.slane %v1943_v33, %v4015_v63 }
 0x176   : > { %v1482_v50 = vrot.slane %v1467_v45, %v4015_v63  ;;  %v1496_v53 = vrot.slane %v1468_v46, %v4015_v63  ;;  %v1099_v20 = vrot.slane %v4120_v58, %v3982_v27  ;;  %v1542_v51 = vrot.slane %v1532_v59, %v4015_v63 }
 0x177   : > { %v1974_v7 = vrot.slane %v1946_v1, %v4015_v63  ;;  %v1967_v52 = vrot.slane %v1945_v40, %v4015_v63  ;;  %v1556_v56 = vrot.slane %v1533_v39, %v4015_v63  ;;  %v1103_v17 = vrot.slane %v4120_v58, %v3990_v41 }
 0x178   : > { %v1498_v54 = vcombine.high %v1482_v50, %v1482_v50  ;;  %v1979_v5 = vcombine.low %v1499_v28, %v1482_v50  ;;  %v1188_v21 = vmul.f32 %v1091_v44, %v4006_v60  ;;  %v1189_v24 = vmul.f32 %v1095_v19, %v4096_v57 }
 0x179   : > { %v1977_v62 = vcombine.low %v1960_v49, %v1974_v7  ;;  %v1978_v4 = vcombine.high %v1960_v49, %v1974_v7  ;;  %v1975_v6 = vcombine.low %v1953_v2, %v1967_v52  ;;  %v1976_v3 = vcombine.high %v1953_v2, %v1967_v52 }
 0x17a   : > { %v1980_v42 = vcombine.low %v1496_v53, %v1498_v54  ;;  %v1981_v8 = vcombine.low %v1542_v51, %v1556_v56  ;;  %v3425_v12 = vcombine.high %v1542_v51, %v1556_v56  ;;  %v1989_v16 = vrot.slane %v1979_v5, %v4015_v63 }
 0x17b   : > { %2353 = vmatprep.mubr.f32.mxu0 %v1977_v62  ;;  %2453 = vmatprep.mubr.f32.mxu1 %v1978_v4  ;;  %v1190_v34 = vmul.f32 %v1099_v20, %v4009_v61  ;;  %v1191_v35 = vmul.f32 %v1103_v17, %v4103_v0  ;;  %v1501_v36 = vcombine.high %v4333_v9, %v4336_v10  ;;  %vm4745_vm14 = vcmask 1045504  }
 0x17c   : > { %2354 = vmatmul.mubr.f32.gmra.mrb[4].mxu0 %v1975_v6  ;;  %2454 = vmatmul.mubr.f32.gmra.mrb[4].mxu1 %v1976_v3  ;;  %v1996_v28 = vrot.slane %v1980_v42, %v4015_v63  ;;  %v2003_v29 = vrot.slane %v1981_v8, %v4015_v63  ;;  %v2010_v30 = vrot.slane %v3425_v12, %v4015_v63  ;;  %vm3005_vm15 = vcmask 261120   ;;  %vm4746_vm6 = vmmov %vm4745_vm14 }
 0x17d   : > { %v1503_v37 = vcombine.high %v4339_v18, %v4342_v25  ;;  %v1517_v23 = vrot.slane %v1501_v36, %v4015_v63  ;;  %v1567_v45 = vcombine.low %v1188_v21, %v1189_v24  ;;  %v1568_v46 = vcombine.high %v1188_v21, %v1189_v24  ;;  %vm4749_vm7 = vmmov %vm4746_vm6 }
 0x17e   : > { %v2012_v43 = vcombine.high %v1989_v16, %v1996_v28  ;;  %v2014_v44 = vcombine.high %v2003_v29, %v2010_v30  ;;  %v2011_v31 = vcombine.low %v1989_v16, %v1996_v28  ;;  %v2013_v22 = vcombine.low %v2003_v29, %v2010_v30 }
 0x17f   : > { %v1531_v33 = vrot.slane %v1503_v37, %v4015_v63  ;;  %v1569_v25 = vcombine.low %v1190_v34, %v1191_v35  ;;  %v1570_v49 = vcombine.high %v1190_v34, %v1191_v35  ;;  %v1577_v7 = vrot.slane %v1567_v45, %v4015_v63 }
 0x180   : > { %v2028_v47 = vrot.slane %v2012_v43, %v4015_v63  ;;  %v2042_v48 = vrot.slane %v2014_v44, %v4015_v63  ;;  %v2021_v1 = vrot.slane %v2011_v31, %v4015_v63  ;;  %v2035_v9 = vrot.slane %v2013_v22, %v4015_v63 }
 0x181   : > { %v1534_v10 = vcombine.low %v1517_v23, %v1531_v33  ;;  %v1535_v18 = vcombine.high %v1517_v23, %v1531_v33  ;;  %v1584_v52 = vrot.slane %v1568_v46, %v4015_v63  ;;  %v1591_v19 = vrot.slane %v1569_v25, %v4015_v63 }
 0x182   : > { %v2045_v40 = vcombine.low %v2028_v47, %v2042_v48  ;;  %v2046_v2 = vcombine.high %v2028_v47, %v2042_v48  ;;  %v2043_v50 = vcombine.low %v2021_v1, %v2035_v9  ;;  %v2044_v53 = vcombine.high %v2021_v1, %v2035_v9 }
 0x183   : > { %v1549_v59 = vrot.slane %v1534_v10, %v4015_v63  ;;  %v1563_v39 = vrot.slane %v1535_v18, %v4015_v63  ;;  %v1598_v20 = vrot.slane %v1570_v49, %v4015_v63  ;;  %v1005_v54 = vcombine.high %v4114_v55, %v4114_v55 }
 0x184   : > { %2358 = vmatprep.mubr.f32.mxu0 %v2045_v40  ;;  %2458 = vmatprep.mubr.f32.mxu1 %v2046_v2  ;;  %v4399_v5 = vcombine.high %v4120_v58, %v4120_v58  ;;  %v1599_v62 = vcombine.low %v1577_v7, %v1591_v19  ;;  %v1600_v4 = vcombine.high %v1577_v7, %v1591_v19  ;;  %vm3808_vm8 = vmmov 1  }
 0x185   : > { %2359 = vmatmul.mubr.f32.gmra.mrb[6].mxu0 %v2043_v50  ;;  %2459 = vmatmul.mubr.f32.gmra.mrb[6].mxu1 %v2044_v53  ;;  %v1565_v51 = vcombine.high %v1549_v59, %v1549_v59  ;;  %v2047_v56 = vcombine.low %v1549_v59, %v1563_v39  ;;  %v1601_v6 = vcombine.low %v1584_v52, %v1598_v20  ;;  %vm4547_vm5 = vmpackc.low %vm2514_vm9, %vm3808_vm8  ;;  %vm2672_vm0 = vcmask 80896  }
 0x186   : > { %v1107_v3 = vrot.slane %v1005_v54, %v3979_v26  ;;  %v1111_v8 = vrot.slane %v1005_v54, %v3985_v38  ;;  %v1115_v12 = vrot.slane %v1005_v54, %v3982_v27  ;;  %v1119_v55 = vrot.slane %v1005_v54, %v3990_v41 }
 0x187   : > { %v2057_v42 = vrot.slane %v2047_v56, %v4015_v63  ;;  %v1609_v16 = vrot.slane %v1599_v62, %v4015_v63  ;;  %v1616_v17 = vrot.slane %v1601_v6, %v4015_v63  ;;  %v1623_v58 = vrot.slane %v1600_v4, %v4015_v63 }
 0x188   : > { %v1192_v21 = vmul.f32 %v1107_v3, %v4006_v60  ;;  %v1193_v24 = vmul.f32 %v1111_v8, %v4096_v57  ;;  %v1194_v28 = vmul.f32 %v1115_v12, %v4009_v61  ;;  %v1195_v29 = vmul.f32 %v1119_v55, %v4103_v0 }
 0x189   : > { %v1602_v30 = vcombine.high %v1584_v52, %v1598_v20  ;;  %v1631_v34 = vcombine.high %v1609_v16, %v1609_v16  ;;  %v1633_v35 = vcombine.high %v1623_v58, %v1623_v58  ;;  %v2048_v36 = vcombine.low %v1565_v51, %v1609_v16 }
 0x18a   : > { %v1632_v37 = vcombine.high %v1616_v17, %v1616_v17  ;;  %v1634_v44 = vcombine.low %v1192_v21, %v1193_v24  ;;  %v1635_v31 = vcombine.high %v1192_v21, %v1193_v24  ;;  %v1636_v22 = vcombine.low %v1194_v28, %v1195_v29 }
 0x18b   : > { %v1630_v43 = vrot.slane %v1602_v30, %v4015_v63  ;;  %v2049_v23 = vcombine.low %v1623_v58, %v1631_v34  ;;  %v2050_v33 = vcombine.low %v1633_v35, %v1616_v17  ;;  %v2064_v45 = vrot.slane %v2048_v36, %v4015_v63 }
 0x18c   : > { %v1637_v46 = vcombine.high %v1194_v28, %v1195_v29  ;;  %v1644_v47 = vrot.slane %v1634_v44, %v4015_v63  ;;  %v1651_v48 = vrot.slane %v1635_v31, %v4015_v63  ;;  %v1658_v1 = vrot.slane %v1636_v22, %v4015_v63 }
 0x18d   : > { %v2115_v9 = vcombine.low %v1630_v43, %v1632_v37  ;;  %v2071_v10 = vrot.slane %v2049_v23, %v4015_v63  ;;  %v2078_v18 = vrot.slane %v2050_v33, %v4015_v63  ;;  %v2080_v25 = vcombine.high %v2057_v42, %v2064_v45 }
 0x18e   : > { %v2079_v49 = vcombine.low %v2057_v42, %v2064_v45  ;;  %v1665_v40 = vrot.slane %v1637_v46, %v4015_v63  ;;  %v1666_v2 = vcombine.low %v1644_v47, %v1658_v1  ;;  %v1667_v50 = vcombine.high %v1644_v47, %v1658_v1 }
 0x18f   : > { %v2125_v53 = vrot.slane %v2115_v9, %v4015_v63  ;;  %v2082_v59 = vcombine.high %v2071_v10, %v2078_v18  ;;  %v2096_v39 = vrot.slane %v2080_v25, %v4015_v63  ;;  %v2081_v7 = vcombine.low %v2071_v10, %v2078_v18 }
 0x190   : > { %v2089_v52 = vrot.slane %v2079_v49, %v4015_v63  ;;  %v1668_v19 = vcombine.low %v1651_v48, %v1665_v40  ;;  %v1669_v20 = vcombine.high %v1651_v48, %v1665_v40  ;;  %v1676_v54 = vrot.slane %v1666_v2, %v4015_v63 }
 0x191   : > { %v1690_v51 = vrot.slane %v1667_v50, %v4015_v63  ;;  %v2110_v56 = vrot.slane %v2082_v59, %v4015_v63  ;;  %v2103_v62 = vrot.slane %v2081_v7, %v4015_v63  ;;  %v1123_v4 = vrot.slane %v4399_v5, %v3979_v26 }
 0x192   : > { %v1127_v6 = vrot.slane %v4399_v5, %v3985_v38  ;;  %v1683_v3 = vrot.slane %v1668_v19, %v4015_v63  ;;  %v1697_v42 = vrot.slane %v1669_v20, %v4015_v63  ;;  %v1131_v29 = vrot.slane %v4399_v5, %v3982_v27 }
 0x193   : > { %v2116_v8 = vcombine.low %v1676_v54, %v1690_v51  ;;  %v3426_v12 = vcombine.high %v1676_v54, %v1690_v51  ;;  %v2113_v55 = vcombine.low %v2096_v39, %v2110_v56  ;;  %v2114_v16 = vcombine.high %v2096_v39, %v2110_v56 }
 0x194   : > { %v2111_v17 = vcombine.low %v2089_v52, %v2103_v62  ;;  %v2112_v58 = vcombine.high %v2089_v52, %v2103_v62  ;;  %v2118_v21 = vcombine.low %v1683_v3, %v1697_v42  ;;  %v1135_v38 = vrot.slane %v4399_v5, %v3990_v41 }
 0x195   : > { %v2132_v24 = vrot.slane %v2116_v8, %v4015_v63  ;;  %v2139_v28 = vrot.slane %v3426_v12, %v4015_v63  ;;  %2363 = vmatprep.mubr.f32.mxu0 %v2113_v55  ;;  %2463 = vmatprep.mubr.f32.mxu1 %v2114_v16  ;;  %v1196_v30 = vmul.f32 %v1123_v4, %v4006_v60 }
 0x196   : > { %v1197_v34 = vmul.f32 %v1127_v6, %v4096_v57  ;;  %2364 = vmatmul.mubr.f32.gmra.mrb[8].mxu0 %v2111_v17  ;;  %2464 = vmatmul.mubr.f32.gmra.mrb[8].mxu1 %v2112_v58  ;;  %v2146_v35 = vrot.slane %v2118_v21, %v4015_v63  ;;  %v1198_v43 = vmul.f32 %v1131_v29, %v4009_v61 }
 0x197   : > { %v2148_v36 = vcombine.high %v2125_v53, %v2132_v24  ;;  %v2147_v37 = vcombine.low %v2125_v53, %v2132_v24  ;;  %v1199_v44 = vmul.f32 %v1135_v38, %v4103_v0  ;;  %v1699_v47 = vcombine.high %v1683_v3, %v1683_v3 }
 0x198   : > { %v1701_v27 = vcombine.low %v1196_v30, %v1197_v34  ;;  %v2150_v31 = vcombine.high %v2139_v28, %v2146_v35  ;;  %v2149_v23 = vcombine.low %v2139_v28, %v2146_v35  ;;  %v1702_v60 = vcombine.high %v1196_v30, %v1197_v34  ;;  %v1768_v34 = vld [vmem:[#allocation2] sm:$0xff] }
 0x199   : > { %v2164_v22 = vrot.slane %v2148_v36, %v4015_v63  ;;  %v2157_v41 = vrot.slane %v2147_v37, %v4015_v63  ;;  %v1703_v5 = vcombine.low %v1198_v43, %v1199_v44  ;;  %v1704_v57 = vcombine.high %v1198_v43, %v1199_v44 }
 0x19a   : > { %v1711_v33 = vrot.slane %v1701_v27, %v4015_v63  ;;  %v2178_v45 = vrot.slane %v2150_v31, %v4015_v63  ;;  %v2171_v46 = vrot.slane %v2149_v23, %v4015_v63  ;;  %v1718_v61 = vrot.slane %v1702_v60, %v4015_v63  ;;  %v1769_v31 = vld [vmem:[#allocation2 + $0x8] sm:$0xff] }
 0x19b   : > { %v1725_v0 = vrot.slane %v1703_v5, %v4015_v63  ;;  %v1732_v48 = vrot.slane %v1704_v57, %v4015_v63 }
 0x19c   : > { %v2181_v1 = vcombine.low %v2164_v22, %v2178_v45  ;;  %v2182_v9 = vcombine.high %v2164_v22, %v2178_v45  ;;  %v2179_v10 = vcombine.low %v2157_v41, %v2171_v46  ;;  %v2180_v18 = vcombine.high %v2157_v41, %v2171_v46 }
 0x19d   : > { %v1733_v25 = vcombine.low %v1711_v33, %v1725_v0  ;;  %v1734_v49 = vcombine.high %v1711_v33, %v1725_v0  ;;  %v1735_v40 = vcombine.low %v1718_v61, %v1732_v48  ;;  %v1736_v2 = vcombine.high %v1718_v61, %v1732_v48  ;;  %v1770_v33 = vld [vmem:[#allocation2 + $0x10] sm:$0xff] }
 0x19e   : > { %2368 = vmatprep.mubr.f32.mxu0 %v2181_v1  ;;  %2468 = vmatprep.mubr.f32.mxu1 %v2182_v9  ;;  %v1771_v1 = vld [vmem:[#allocation2 + $0x18] sm:$0xff] }
 0x19f   : > { %2369 = vmatmul.mubr.f32.gmra.mrb[10].mxu0 %v2179_v10  ;;  %2469 = vmatmul.mubr.f32.gmra.mrb[10].mxu1 %v2180_v18  ;;  %v1743_v50 = vrot.slane %v1733_v25, %v4015_v63  ;;  %v1750_v53 = vrot.slane %v1735_v40, %v4015_v63  ;;  %v1757_v59 = vrot.slane %v1734_v49, %v4015_v63 }
 0x1a0   : > { %v1764_v39 = vrot.slane %v1736_v2, %v4015_v63 }
 0x1a1   : > { %v1765_v7 = vcombine.high %v1743_v50, %v1743_v50  ;;  %v1766_v52 = vcombine.high %v1750_v53, %v1750_v53  ;;  %v1767_v19 = vcombine.high %v1757_v59, %v1757_v59  ;;  %v2183_v20 = vcombine.low %v1699_v47, %v1743_v50 }
 0x1a3   : > { %v2184_v54 = vcombine.low %v1757_v59, %v1765_v7  ;;  %v2185_v51 = vcombine.low %v1767_v19, %v1750_v53  ;;  %v2186_v56 = vcombine.low %v1764_v39, %v1766_v52  ;;  %v2193_v62 = vrot.slane %v2183_v20, %v4015_v63 }
 0x1a5   : > { %v2200_v4 = vrot.slane %v2184_v54, %v4015_v63  ;;  %v2207_v6 = vrot.slane %v2185_v51, %v4015_v63  ;;  %v2214_v3 = vrot.slane %v2186_v56, %v4015_v63 }
 0x1a7   : > { %v2216_v42 = vcombine.high %v2193_v62, %v2200_v4  ;;  %v2218_v8 = vcombine.high %v2207_v6, %v2214_v3  ;;  %v2215_v12 = vcombine.low %v2193_v62, %v2200_v4  ;;  %v2217_v55 = vcombine.low %v2207_v6, %v2214_v3  ;;  %v1772_v62 = vld [vmem:[#allocation2 + $0x20] sm:$0xff] }
 0x1a9   : > { %v2232_v16 = vrot.slane %v2216_v42, %v4015_v63  ;;  %v2246_v17 = vrot.slane %v2218_v8, %v4015_v63  ;;  %v2225_v58 = vrot.slane %v2215_v12, %v4015_v63  ;;  %v2239_v21 = vrot.slane %v2217_v55, %v4015_v63 }
 0x1ab   : > { %v2249_v24 = vcombine.low %v2232_v16, %v2246_v17  ;;  %v2250_v28 = vcombine.high %v2232_v16, %v2246_v17  ;;  %v2247_v29 = vcombine.low %v2225_v58, %v2239_v21  ;;  %v2248_v38 = vcombine.high %v2225_v58, %v2239_v21  ;;  %v1773_v16 = vld [vmem:[#allocation2 + $0x28] sm:$0xff] }
 0x1ad   : > { %2373 = vmatprep.mubr.f32.mxu0 %v2249_v24  ;;  %2473 = vmatprep.mubr.f32.mxu1 %v2250_v28 }
 0x1ae   : > { %2374 = vmatmul.mubr.f32.gmra.mrb[12].mxu0 %v2247_v29  ;;  %2474 = vmatmul.mubr.f32.gmra.mrb[12].mxu1 %v2248_v38 }
 0x1af   : > { %2752 = vmatprep.mubr.f32.mxu0 %v3802_v32  ;;  %2823 = vmatprep.mubr.f32.mxu1 %v3802_v32 }
 0x236   : > { %v2345_v30 = vpop.f32.mrb[0].mxu0  ;;  %v2445_v35 = vpop.f32.mrb[0].mxu1 }
 0x237   : > { %v2446_v36 = vadd.f32 %v2445_v35, %v2345_v30  ;;  %v2347_v37 = vpop.f32.mrb[1].mxu0  ;;  %v2447_v43 = vpop.f32.mrb[1].mxu1 }
 0x239   : > { %v2479_v44 = vadd.f32 %v2446_v36, %v1768_v34  ;;  %v1774_v36 = vld [vmem:[#allocation2 + $0x30] sm:$0xff] }
 0x23b   : > { %2487 = vst.msk [vmem:[#allocation2] sm:$0xff] %vm639_vm4, %v2479_v44 }
 0x240   : > { %v2350_v27 = vpop.f32.mrb[2].mxu0  ;;  %v2450_v22 = vpop.f32.mrb[2].mxu1 }
 0x241   : > { %v2451_v23 = vadd.f32 %v2450_v22, %v2350_v27  ;;  %v2352_v41 = vpop.f32.mrb[3].mxu0  ;;  %v2452_v60 = vpop.f32.mrb[3].mxu1 }
 0x242   : > { %v4488_v19 = vld [vmem:[#allocation2] sm:$0xff] }
 0x243   : > { %v2480_v5 = vadd.f32 %v2451_v23, %v1769_v31  ;;  %v2507_v51 = vrot.slane %v4488_v19, 7 }
 0x245   : > { %2488 = vst.msk [vmem:[#allocation2 + $0x8] sm:$0xff] %vm639_vm4, %v2480_v5 }
 0x24c   : > { %v2498_v49 = vld [vmem:[#allocation2 + $0x8] sm:$0xff] }
 0x24d   : > { %v2515_v53 = vrot.slane %v2498_v49, 6  ;;  %v2508_v54 = vrot.slane %v2498_v49, 7 }
 0x24f   : > { %v2355_v57 = vpop.f32.mrb[4].mxu0  ;;  %v2455_v45 = vpop.f32.mrb[4].mxu1  ;;  %v2509_v8 = vsel %vm2506_vm11, %v2507_v51, %v2508_v54  ;;  %v4523_v51 = vsub.s32 6, %v3956_v13 }
 0x250   : > { %v2456_v46 = vadd.f32 %v2455_v45, %v2355_v57  ;;  %v2357_v47 = vpop.f32.mrb[5].mxu0  ;;  %v2457_v61 = vpop.f32.mrb[5].mxu1 }
 0x251   : > { %v3470_v47 = vld [vmem:[%s625_s21] ss:$0 sm:$0xff]  ;;  %s3482_s21 = sshll.u32 %s3787_s18, 6 }
 0x252   : > { %v2481_v0 = vadd.f32 %v2456_v46, %v1770_v33  ;;  %v3469_v61 = vld [vmem:[%s622_s30] ss:$0 sm:$0xff]  ;;  %s4635_s30 = scalar_lea.hbm %s4724_s13, %s3482_s21 }
 0x253   : > { %3022 = vrot.lane.b32.xlu0 %v3469_v61, %s3806_s3 }
 0x254   : > { %2489 = vst.msk [vmem:[#allocation2 + $0x10] sm:$0xff] %vm639_vm4, %v2481_v0  ;;  %v2662_v0 = vld [vmem:[#allocation3] sm:$0x1] }
 0x258   : > { %v2360_v48 = vpop.f32.mrb[6].mxu0  ;;  %v2460_v9 = vpop.f32.mrb[6].mxu1 }
 0x259   : > { %v2461_v10 = vadd.f32 %v2460_v9, %v2360_v48  ;;  %v2362_v18 = vpop.f32.mrb[7].mxu0  ;;  %v2462_v25 = vpop.f32.mrb[7].mxu1 }
 0x25b   : > { %v2482_v40 = vadd.f32 %v2461_v10, %v1771_v1  ;;  %v2499_v2 = vld [vmem:[#allocation2 + $0x10] sm:$0xff] }
 0x25c   : > { %v2516_v50 = vrot.slane %v2499_v2, 6  ;;  %v2520_v7 = vrot.slane %v2499_v2, 5 }
 0x25d   : > { %2490 = vst.msk [vmem:[#allocation2 + $0x18] sm:$0xff] %vm639_vm4, %v2482_v40 }
 0x25e   : > { %v4486_v59 = vsel %vm2514_vm9, %v2515_v53, %v2516_v50  ;;  %v2593_v50 = vld [vmem:[%s4718_s7] sm:$0x77]  ;;  %v2600_v53 = vpop.permute.xlu0 %2599 }
 0x264   : > { %v2500_v39 = vld [vmem:[#allocation2 + $0x18] sm:$0xff] }
 0x265   : > { %v2521_v52 = vrot.slane %v2500_v39, 5  ;;  %v2528_v38 = vrot.slane %v2500_v39, 4  ;;  %v2595_v39 = vadd.f32 0.5, %v2593_v50 }
 0x267   : > { %v2522_v20 = vsel %vm4744_vm10, %v2520_v7, %v2521_v52  ;;  %v2607_v7 = vrot.slane %v2600_v53, %v3960_v14 }
 0x268   : > { %2523 = vrot.lane.b32.xlu1 %v2522_v20, %s3804_s0 }
 0x269   : > { %v2365_v56 = vpop.f32.mrb[8].mxu0  ;;  %v2465_v4 = vpop.f32.mrb[8].mxu1  ;;  %v2609_v52 = vmul.f32 %v2607_v7, %v2595_v39 }
 0x26a   : > { %v2466_v6 = vadd.f32 %v2465_v4, %v2365_v56  ;;  %v2367_v3 = vpop.f32.mrb[9].mxu0  ;;  %v2467_v42 = vpop.f32.mrb[9].mxu1 }
 0x26b   : > { %v2613_v20 = vcombine.high %v2609_v52, %v2609_v52  ;;  %v2617_v3 = vadd.f32 %v2609_v52, %v3965_v15 }
 0x26c   : > { %2510 = vrot.lane.b32.xlu1 %v2509_v8, %s3804_s0  ;;  %v2483_v12 = vadd.f32 %v2466_v6, %v1772_v62 }
 0x26d   : > { %v2618_v54 = vadd.f32 %v2613_v20, %v3965_v15  ;;  %v3042_v20 = vld [vmem:[%s4721_s10] sm:$0xff] }
 0x26e   : > { %2491 = vst.msk [vmem:[#allocation2 + $0x20] sm:$0xff] %vm639_vm4, %v2483_v12 }
 0x26f   : > { %v2626_v42 = vrot.slane %v2618_v54, 2  ;;  %v3043_v54 = vld [vmem:[%s4721_s10 + $0x8] sm:$0xff] }
 0x272   : > { %v2370_v55 = vpop.f32.mrb[10].mxu0  ;;  %v2470_v17 = vpop.f32.mrb[10].mxu1 }
 0x273   : > { %v2471_v58 = vadd.f32 %v2470_v17, %v2370_v55  ;;  %v2372_v21 = vpop.f32.mrb[11].mxu0  ;;  %v2472_v24 = vpop.f32.mrb[11].mxu1  ;;  %v2625_v17 = vrot.slane %v2617_v3, 2 }
 0x275   : > { %v2484_v28 = vadd.f32 %v2471_v58, %v1773_v16  ;;  %v2501_v29 = vld [vmem:[#allocation2 + $0x20] sm:$0xff] }
 0x276   : > { %v2529_v30 = vrot.slane %v2501_v29, 4  ;;  %v2534_v45 = vrot.slane %v2501_v29, 3 }
 0x277   : > { %2492 = vst.msk [vmem:[#allocation2 + $0x28] sm:$0xff] %vm639_vm4, %v2484_v28 }
 0x278   : > { %v4497_v34 = vsel %vm2527_vm12, %v2528_v38, %v2529_v30 }
 0x27e   : > { %v2502_v22 = vld [vmem:[#allocation2 + $0x28] sm:$0xff] }
 0x27f   : > { %v2541_v5 = vrot.slane %v2502_v22, 2  ;;  %v2535_v57 = vrot.slane %v2502_v22, 3  ;;  %v3809_v22 = vmov 0.001953125  }
 0x281   : > { %v2375_v35 = vpop.f32.mrb[12].mxu0  ;;  %v2475_v37 = vpop.f32.mrb[12].mxu1  ;;  %v2536_v46 = vsel %vm2533_vm13, %v2534_v45, %v2535_v57 }
 0x282   : > { %v2476_v43 = vadd.f32 %v2475_v37, %v2375_v35  ;;  %v2377_v44 = vpop.f32.mrb[13].mxu0  ;;  %v2477_v27 = vpop.f32.mrb[13].mxu1 }
 0x283   : > { %v2594_v44 = vld [vmem:[%s4718_s7 + $0x8] sm:$0x77]  ;;  %v2661_v27 = vld [vmem:[%s4719_s8] sm:$0x1] }
 0x284   : > { %v2485_v31 = vadd.f32 %v2476_v43, %v1774_v36 }
 0x286   : > { %2493 = vst.msk [vmem:[#allocation2 + $0x30] sm:$0xff] %vm639_vm4, %v2485_v31  ;;  %v2596_v31 = vadd.f32 0.5, %v2594_v44 }
 0x28d   : > { %v2503_v23 = vld [vmem:[#allocation2 + $0x30] sm:$0xff] }
 0x28e   : > { %v2545_v41 = vrot.slane %v2503_v23, 1  ;;  %v2542_v60 = vrot.slane %v2503_v23, 2  ;;  %v2610_v23 = vmul.f32 %v2607_v7, %v2596_v31 }
 0x290   : > { %2546 = vrot.lane.b32.xlu1 %v2545_v41, %s3804_s0  ;;  %v4502_v33 = vsel %vm4745_vm14, %v2541_v5, %v2542_v60  ;;  %v2614_v41 = vcombine.high %v2610_v23, %v2610_v23  ;;  %vm3038_vm14 = vcmask 113664  }
 0x292   : > { %v2620_v60 = vadd.f32 %v2614_v41, %v3965_v15 }
 0x294   : > { %2537 = vrot.lane.b32.xlu1 %v2536_v46, %s3804_s0  ;;  %s629_s0 = scalar_lea.vmem %s4717_s6, %s3382_s2  ;;  %s3481_s2 = sshll.u32 %s3949_s28, 6  ;;  %v2628_v61 = vrot.slane %v2620_v60, 2 }
 0x295   : > { %v3004_v48 = vld [vmem:[%s629_s0] sm:$0xff]  ;;  %s4534_s22 = scalar_lea.vmem %s4723_s12, %s3481_s2  ;;  %s3689_s2 = sshll.u32 %s3812_s9, 4  ;;  %s3690_s2 = int_to_ptr.vmem [resolvable:$false] %s3689_s2 }
 0x296   : > { %v3006_v1 = vsel %vm3005_vm15, %v3004_v48, 0.0  ;;  %vm3040_vm15 = vcmask 375808   ;;  %s3691_s3 = scalar_lea.vmem %s3690_s2, 128 }
 0x297   : > { %v3007_v9 = vrot.slane %v3006_v1, 4 }
 0x298   : > { %3030 = vrot.lane.b32.xlu1 %v3470_v47, %s3805_s1  ;;  %s3807_s1 = smov 46   ;;  %v2619_v47 = vadd.f32 %v2610_v23, %v3965_v15 }
 0x299   : > { %v3008_v10 = vadd.f32 %v3007_v9, %v3006_v1 }
 0x29b   : > { %v3009_v18 = vrot.slane %v3008_v10, 2 }
 0x29c   : > { %2665 = vperm.xlu1 %3669, %v2662_v0  }
 0x29d   : > { %v3010_v25 = vadd.f32 %v3009_v18, %v3008_v10 }
 0x29f   : > { %v3011_v49 = vrot.slane %v3010_v25, 1 }
 0x2a1   : > { %v3012_v40 = vadd.f32 %v3011_v49, %v3010_v25  ;;  %v2627_v25 = vrot.slane %v2619_v47, 2 }
 0x2a3   : > { %v3014_v2 = vmul.f32 0.125, %v3012_v40 }
 0x2a5   : > { %3034 = vrot.lane.b32.xlu0 %v3014_v2, %s3807_s1  ;;  %s3138_s1 = scalar_lea.sflag [#allocation5], %s4623_s19 }
 0x2da   : > { %v2524_v56 = vpop.permute.xlu1 %2523 }
 0x2db   : > { %v2550_v62 = vsel %vm639_vm4, %v4486_v59, %v2524_v56  ;;  %v3570_v56 = vpack.c.bf16 %v3043_v54, %v3042_v20 }
 0x2dc   : > { %v2554_v4 = vmax.f32 %v2550_v62, 1.0  ;;  %vm2582_vm2 = vcmp.gt.f32.partialorder %v2550_v62, 0.0 }
 0x2dd   : > { %v3460_v6 = vsel %vm2582_vm2, 1.0, %v3802_v32  ;;  %vm3053_vm2 = vcmask 637952  }
 0x2de   : > { %v2564_v14 = vrot.slane %v2554_v4, %v4523_v51  ;;  %v2638_v8 = vrot.slane %v3460_v6, 5  ;;  %v2511_v13 = vpop.permute.xlu1 %2510  ;;  %v3044_v4 = vld [vmem:[%s4721_s10 + $0x10] sm:$0xff]  ;;  %v3045_v6 = vld [vmem:[%s4721_s10 + $0x18] sm:$0xff] }
 0x2df   : > { %v2549_v59 = vsel %vm639_vm4, %v4488_v19, %v2511_v13  ;;  %v3573_v3 = vpack.c.bf16 %v3045_v6, %v3044_v4 }
 0x2e0   : > { %3677 = vrcp.f32 %v2564_v14  ;;  %v2553_v12 = vmax.f32 %v2549_v59, 1.0  ;;  %vm2581_vm3 = vcmp.gt.f32.partialorder %v2549_v59, 0.0  ;;  %v2650_v55 = vsel %vm2506_vm11, %v2626_v42, %v2638_v8  ;;  %v3047_v14 = vld [vmem:[%s4721_s10 + $0x28] sm:$0xff]  ;;  %v3048_v8 = vld [vmem:[%s4721_s10 + $0x30] sm:$0xff] }
 0x2e1   : > { %v3459_v16 = vsel %vm2581_vm3, 1.0, %v3802_v32  ;;  %2658 = vst [vmem:[%s4534_s22 + $0x28] sm:$0x3] %v2650_v55  ;;  %vm2861_vm3 = vcmp.lt.s32.totalorder %v669_v11, 512 }
 0x2e2   : > { %v2560_v58 = vrot.slane %v2553_v12, %v4523_v51  ;;  %v2637_v21 = vrot.slane %v3459_v16, 5  ;;  %v3051_v16 = vld [vmem:[%s4721_s10 + $0x48] sm:$0x3f] }
 0x2e4   : > { %3679 = vrcp.f32 %v2560_v58  ;;  %v2649_v24 = vsel %vm2506_vm11, %v2625_v17, %v2637_v21 }
 0x2e5   : > { %2657 = vst [vmem:[%s4534_s22 + $0x20] sm:$0x3] %v2649_v24 }
 0x2ea   : > { %v3678_v28 = vpop.eup %3677 }
 0x2eb   : > { %v2576_v19 = vmul.f32 %v3678_v28, %v2550_v62  ;;  %v3810_v62 = vmov 0.0|0.0  }
 0x2ed   : > { %v2646_v29 = vsel %vm4746_vm6, %v2576_v19, %v2626_v42  ;;  %v3046_v42 = vld [vmem:[%s4721_s10 + $0x20] sm:$0xff] }
 0x2ee   : > { %v3680_v30 = vpop.eup %3679  ;;  %2654 = vst [vmem:[%s4534_s22 + $0x8] sm:$0xff] %v2646_v29  ;;  %v3549_v35 = vpack.c.bf16 %v2650_v55, %v2646_v29  ;;  %v3576_v13 = vpack.c.bf16 %v3047_v14, %v3046_v42  ;;  %v3050_v55 = vld [vmem:[%s4721_s10 + $0x40] sm:$0xff] }
 0x2ef   : > { %v2574_v36 = vmul.f32 %v3680_v30, %v2549_v59  ;;  %v3049_v59 = vld [vmem:[%s4721_s10 + $0x38] sm:$0xff]  ;;  %v3023_v30 = vpop.permute.xlu0 %3022 }
 0x2f0   : > { %3551 = vmatprep.subr.msk.bf16.mxu0 %vm4547_vm5, %v3549_v35  ;;  %v3579_v12 = vpack.c.bf16 %v3049_v59, %v3048_v8 }
 0x2f1   : > { %v2645_v37 = vsel %vm4749_vm7, %v2574_v36, %v2625_v17  ;;  %v3582_v17 = vpack.c.bf16 %v3051_v16, %v3050_v55 }
 0x2f2   : > { %2653 = vst [vmem:[%s4534_s22] sm:$0xff] %v2645_v37  ;;  %v3552_v43 = vpack.c.bf16 %v2649_v24, %v2645_v37 }
 0x2f4   : > { %3554 = vmatpush1.bf16.msk.msra.mxu0 %vm4547_vm5, %v3552_v43 }
 0x2f5   : > { %3562 = vmatprep.subr.bf16.mxu0 %v3549_v35 }
 0x2f7   : > { %3465 = vmatmul.mubr.msk.f32.vlgmr.msra.gmra.mrb[14].mxu0 %vm2672_vm0, %v2661_v27 }
 0x2f8   : > { %2928 = vmatprep.mubr.f32.mxu0 %v3809_v22 }
 0x2fd   : > { %3564 = vmatpush1.bf16.xpose.msra.mxu0 %v3552_v43 }
 0x302   : > { %v2547_v5 = vpop.permute.xlu1 %2546 }
 0x303   : > { %v2552_v57 = vsel %vm639_vm4, %v4502_v33, %v2547_v5 }
 0x304   : > { %2929 = vmatmul.mubr.f32.vlgmr.msra.gmra.mrb[16].mxu0 %v3809_v22  ;;  %v2556_v45 = vmax.f32 %v2552_v57, 1.0  ;;  %vm2584_vm1 = vcmp.gt.f32.partialorder %v2552_v57, 0.0 }
 0x305   : > { %2998 = vmatprep.mubr.f32.mxu0 %v3809_v22  ;;  %v3462_v46 = vsel %vm2584_vm1, 1.0, %v3802_v32 }
 0x306   : > { %v2572_v0 = vrot.slane %v2556_v45, %v4523_v51  ;;  %v2640_v48 = vrot.slane %v3462_v46, 5  ;;  %v2538_v1 = vpop.permute.xlu1 %2537 }
 0x307   : > { %v2551_v9 = vsel %vm639_vm4, %v4497_v34, %v2538_v1  ;;  %vm4750_vm4 = vmmov %vm4746_vm6 }
 0x308   : > { %3681 = vrcp.f32 %v2572_v0  ;;  %v2555_v33 = vmax.f32 %v2551_v9, 1.0  ;;  %vm2583_vm9 = vcmp.gt.f32.partialorder %v2551_v9, 0.0  ;;  %v2652_v10 = vsel %vm2506_vm11, %v2628_v61, %v2640_v48  ;;  %vm4751_vm10 = vmmov %vm4750_vm4 }
 0x309   : > { %v3461_v18 = vsel %vm2583_vm9, 1.0, %v3802_v32  ;;  %2660 = vst [vmem:[%s4534_s22 + $0x38] sm:$0x3] %v2652_v10  ;;  %vm4752_vm12 = vmmov %vm4750_vm4 }
 0x30a   : > { %v2568_v15 = vrot.slane %v2555_v33, %v4523_v51  ;;  %v2639_v49 = vrot.slane %v3461_v18, 5  ;;  %vm3583_vm13 = vmpackc.low %vm4752_vm12, %vm3808_vm8 }
 0x30c   : > { %3683 = vrcp.f32 %v2568_v15  ;;  %v2651_v40 = vsel %vm2506_vm11, %v2627_v25, %v2639_v49  ;;  %vm3811_vm11 = vmmov 0  }
 0x30d   : > { %2659 = vst [vmem:[%s4534_s22 + $0x30] sm:$0x3] %v2651_v40 }
 0x312   : > { %v3682_v2 = vpop.eup %3681 }
 0x313   : > { %v2580_v34 = vmul.f32 %v3682_v2, %v2552_v57 }
 0x315   : > { %v2648_v50 = vsel %vm4750_vm4, %v2580_v34, %v2628_v61 }
 0x316   : > { %v3684_v53 = vpop.eup %3683  ;;  %2656 = vst [vmem:[%s4534_s22 + $0x18] sm:$0xff] %v2648_v50  ;;  %v3555_v39 = vpack.c.bf16 %v2652_v10, %v2648_v50 }
 0x317   : > { %v2578_v7 = vmul.f32 %v3684_v53, %v2551_v9  ;;  %v3035_v31 = vpop.permute.xlu0 %3034 }
 0x318   : > { %3557 = vmatprep.subr.msk.bf16.mxu1 %vm4547_vm5, %v3555_v39  ;;  %3566 = vmatprep.subr.bf16.mxu0 %v3555_v39 }
 0x319   : > { %v2647_v52 = vsel %vm4751_vm10, %v2578_v7, %v2627_v25 }
 0x31a   : > { %2655 = vst [vmem:[%s4534_s22 + $0x10] sm:$0xff] %v2647_v52  ;;  %v3558_v51 = vpack.c.bf16 %v2651_v40, %v2647_v52  ;;  %s3376_s22 = sshll.u32 %s4623_s19, 2 }
 0x31b   : > { %s584_s28 = scalar_lea.vmem [#allocation4], %s3376_s22 }
 0x31c   : > { %3560 = vmatpush1.bf16.msk.msra.mxu1 %vm4547_vm5, %v3558_v51  ;;  %3568 = vmatpush1.bf16.xpose.msra.mxu0 %v3558_v51  ;;  %s3159_s0 = sshll.u32 %s584_s28, 4  ;;  %s3160_s0 = int_to_ptr.vmem [resolvable:$true] %s3159_s0 }
 0x31d   : > { %3569 = vmatprep.subr.bf16.mxu1 %v3810_v62  ;;  %s3685_s25 = scalar_lea.vmem %s3160_s0, 64  ;;  %p3692_p1 = scmp.lt.s32.totalorder %s3160_s0, %s3690_s2 }
 0x31e   : > { %p3686_p12 = scmp.ne.s32.totalorder %s3160_s0, %s3685_s25  ;;  %p3693_p2 = scmp.lt.s32.totalorder %s3691_s3, %s3685_s25 }
 0x31f   : > { %3468 = vmatmul.mubr.msk.f32.vlgmr.msra.gmra.mrb[14].mxu1 %vm2672_vm0, %v2661_v27 }
 0x320   : > { %3571 = vmatpush3.bf16.msra.mxu1 %v3570_v56  ;;  %3514 = vmatprep.mubr.msk.f32.mxu1 %vm3811_vm11, %v3802_v32  ;;  %v3031_v32 = vpop.permute.xlu1 %3030  ;;  %p3687_p13 = pnand %p3686_p12, %p3932_p4  ;;  %p3694_p3 = por %p3693_p2, %p3692_p1 }
 0x321   : > { %3572 = vmatprep.subr.bf16.mxu1 %v3810_v62 }
 0x322   : > { %p3688_p0 = pneg %p3687_p13 }
 0x323   : > { %2999 = vmatmul.mubr.f32.vlgmr.msra.gmra.mrb[16].mxu0 %v3809_v22 }
 0x324   : > { %3574 = vmatpush3.bf16.msra.mxu1 %v3573_v3  ;;  %v2666_v58 = vpop.permute.xlu1 %2665  ;;  %p3695_p5 = pnand %p3694_p3, %p3688_p0 }
 0x325   : > { %3575 = vmatprep.subr.bf16.mxu1 %v3810_v62  ;;  %v2671_v21 = vrot.slane %v2666_v58, %v3979_v26 }
 0x328   : > { %3577 = vmatpush3.bf16.msra.mxu1 %v3576_v13 }
 0x329   : > { %3578 = vmatprep.subr.bf16.mxu1 %v3810_v62 }
 0x32c   : > { %3580 = vmatpush3.bf16.msra.mxu1 %v3579_v12 }
 0x32d   : > { %3581 = vmatprep.subr.bf16.mxu1 %v3810_v62 }
 0x330   : > { %3584 = vmatpush3.bf16.msk.msra.mxu1 %vm3583_vm13, %v3582_v17 }
 0x3ca   : > { %v2754_v24 = vpop.f32.mrb[14].mxu0 }
 0x3cb   : > { %v2755_v28 = vadd.f32 %v2754_v24, %v2671_v21  ;;  %v2756_v19 = vpop.f32.mrb[15].mxu0 }
 0x3cc   : > { %v2757_v29 = vadd.f32 %v2756_v19, %v2671_v21 }
 0x3ce   : > { %v2834_v38 = vcombine.low %v2755_v28, %v2757_v29 }
 0x3d0   : > { %v2842_v23 = vrot.slane %v2834_v38, %v4015_v63 }
 0x3f2   : > { %v2825_v35 = vpop.f32.mrb[14].mxu1 }
 0x3f3   : > { %v2826_v36 = vadd.f32 %v2825_v35, %v2671_v21  ;;  %v2827_v37 = vpop.f32.mrb[15].mxu1 }
 0x3f4   : > { %v2828_v43 = vadd.f32 %v2827_v37, %v2671_v21 }
 0x3f6   : > { %v2835_v44 = vcombine.low %v2826_v36, %v2828_v43  ;;  %v3000_v27 = vpop.f32.mrb[16].mxu0 }
 0x3f7   : > { %v3037_v26 = vsel %vm2672_vm0, %v3000_v27, %v3023_v30  ;;  %v3002_v22 = vpop.f32.mrb[17].mxu0 }
 0x3f8   : > { %v2849_v41 = vrot.slane %v2835_v44, %v4015_v63  ;;  %v3039_v60 = vsel %vm3038_vm14, %v3037_v26, %v3031_v32 }
 0x3f9   : > { %v3041_v5 = vsel %vm3040_vm15, %v3039_v60, %v3035_v31 }
 0x3fa   : > { %v2850_v57 = vcombine.low %v2842_v23, %v2849_v41  ;;  %3515 = vmatmul.mubr.msk.f32.vlgmr.msra.gmra.mrb[16].mxu1 %vm3053_vm2, %v3041_v5 }
 0x3fc   : > { %v2857_v45 = vrot.slane %v2850_v57, %v4015_v63 }
 0x3fe   : > { %2863 = vst.msk [vmem:[%s584_s28] sm:$0xf] %vm2861_vm3, %v2857_v45 }
 0x3ff   : > { %3698 = shalt.err (!%p3695_p5)
}
 0x400   : > { %s3699_s22 = scalar_lea.hbm %s4635_s30, 64  ;;  %s3703_s23 = scalar_lea.hbm %s4724_s13, 128 }
 0x401   : > { %p3700_p6 = scmp.ne.s32.totalorder %s4635_s30, %s3699_s22  ;;  %p3704_p10 = scmp.lt.u32.totalorder %s4635_s30, %s4724_s13 }
 0x402   : > { %p3705_p11 = scmp.lt.u32.totalorder %s3703_s23, %s3699_s22  ;;  %p3707_p13 = scmp.lt.u32.totalorder %s3699_s22, %s4635_s30 }
 0x403   : > { %p3701_p7 = pnand %p3700_p6, %p3932_p4 }
 0x404   : > { %p3706_p12 = por %p3705_p11, %p3704_p10 }
 0x405   : > { %p3702_p9 = pneg %p3701_p7 }
 0x406   : > { %p3708_p0 = por %p3707_p13, %p3706_p12 }
 0x408   : > { %p3709_p1 = pnand %p3708_p0, %p3702_p9 }
 0x40a   : > { %3712 = shalt.err (!%p3709_p1)
}
 0x40b   : > { %3591 = dma.vmem_to_hbm [thread:$0]  (%p3932_p4), %s3160_s0, 64, %s4635_s30, %s3138_s1   ;;  %v3052_v11 = vld [vmem:[%s4722_s11] sm:$0x1]  ;;  %vm3130_vm6 = vcmask 221184  }
 0x40c   : > { %s3476_s3 = sshll.u32 %s3787_s18, 4  ;;  %s590_s28 = scalar_lea.vmem [#allocation6], %s4623_s19 }
 0x40d   : > { %s3172_s21 = sshll.u32 %s590_s28, 4  ;;  %s4663_s29 = scalar_lea.hbm %s4725_s14, %s3476_s3  ;;  %s4665_s21 = int_to_ptr.vmem [resolvable:$true] %s3172_s21 }
 0x40e   : > { %s3143_s30 = scalar_lea.sflag [#allocation7], %s4623_s19  ;;  %s3713_s0 = scalar_lea.vmem %s4665_s21, 16 }
 0x40f   : > { %p3714_p2 = scmp.ne.s32.totalorder %s4665_s21, %s3713_s0  ;;  %s3813_s18 = smov [#allocation6]  }
 0x410   : > { %s3717_s1 = sshll.u32 %s3813_s18, 4  ;;  %s3718_s1 = int_to_ptr.vmem [resolvable:$false] %s3717_s1 }
 0x411   : > { %p3715_p3 = pnand %p3714_p2, %p3932_p4  ;;  %s3719_s9 = scalar_lea.vmem %s3718_s1, 32 }
 0x412   : > { %p3720_p6 = scmp.lt.s32.totalorder %s4665_s21, %s3718_s1  ;;  %p3721_p7 = scmp.lt.s32.totalorder %s3719_s9, %s3713_s0 }
 0x413   : > { %p3716_p5 = pneg %p3715_p3 }
 0x414   : > { %p3722_p9 = por %p3721_p7, %p3720_p6 }
 0x416   : > { %p3723_p10 = pnand %p3722_p9, %p3716_p5 }
 0x4cd   : > { %v3126_v63 = vpop.f32.mrb[16].mxu1 }
 0x4ce   : > { %v3127_v46 = vadd.f32 %v3126_v63, %v3052_v11  ;;  %v3516_v47 = vpop.f32.mrb[17].mxu1 }
 0x4d0   : > { %3131 = vst.msk [vmem:[%s590_s28] sm:$0x1] %vm3130_vm6, %v3127_v46 }
 0x4d1   : > { %3726 = shalt.err (!%p3723_p10)
}
 0x4d2   : > { %s3727_s19 = scalar_lea.hbm %s4663_s29, 16  ;;  %s3731_s3 = scalar_lea.hbm %s4725_s14, 32 }
 0x4d3   : > { %p3728_p11 = scmp.ne.s32.totalorder %s4663_s29, %s3727_s19  ;;  %p3732_p0 = scmp.lt.u32.totalorder %s4663_s29, %s4725_s14 }
 0x4d4   : > { %p3733_p1 = scmp.lt.u32.totalorder %s3731_s3, %s3727_s19  ;;  %p3735_p3 = scmp.lt.u32.totalorder %s3727_s19, %s4663_s29 }
 0x4d5   : > { %p3729_p12 = pnand %p3728_p11, %p3932_p4 }
 0x4d6   : > { %p3734_p2 = por %p3733_p1, %p3732_p0 }
 0x4d7   : > { %p3730_p13 = pneg %p3729_p12 }
 0x4d8   : > { %p3736_p5 = por %p3735_p3, %p3734_p2 }
 0x4da   : > { %p3737_p6 = pnand %p3736_p5, %p3730_p13 }
 0x4dc   : > { %3740 = shalt.err (!%p3737_p6)
}
 0x4dd   : > { %3592 = dma.vmem_to_hbm [thread:$0]  (%p3932_p4), %s4665_s21, 16, %s4663_s29, %s3143_s30  }
 0x4de PF: > { %p3602_p7 = scmp.ge.s32.totalorder %s3795_s20, 2  ;;  %s3192_s23 = sand.u32 1, %s3775_s15  }
 0x4df   : > { %s3193_s0 = scalar_lea.sflag [#allocation5], %s3192_s23 }
 0x4e0   : > { %p3596_p9 = pnand %p3602_p7, %p3939_p8 }
 0x4e2   : > { %3766 = dma.done.wait (!%p3596_p9), %s3193_s0, 64  }
 0x4e3   : > { %3768 = vsyncadd (!%p3596_p9), %s3193_s0, 4294967232  ;;  %s3202_s18 = scalar_lea.sflag [#allocation7], %s3192_s23 }
 0x4e4   : > { %3770 = dma.done.wait (!%p3596_p9), %s3202_s18, 16  }
 0x4e5   : > { %3772 = vsyncadd (!%p3596_p9), %s3202_s18, 4294967280  ;;  %s33_s20 = sadd.s32 1, %s3795_s20   ;;  %s4753_s18 = sld [smem:[#allocation10_spill]] }
 0x4e6   : > { %p30_p10 = scmp.ge.s32.totalorder %s33_s20, 4   ;;  %s4754_s19 = sld [smem:[#allocation11_spill]] }
 0x4e7   : > { %s4755_s15 = smov %s3779_s16  ;;  %s4756_s16 = smov %s3783_s17 }
 0x4e8   : > { %s4757_s17 = smov %s3945_s27  ;;  %32 = sbr.rel (!%p30_p10) target bundleno = 11 (0xb), region = 158 }
 0x4ef   :  { %3206 = vsyncpa [#allocation5], 1 }
 0x4f0   :  { %3208 = vsyncpa [#allocation5 + $0x1], 1 }
 0x4f1   :  { %3209 = vsyncpa [#allocation7], 1 }
 0x4f2   :  { %3211 = vsyncpa [#allocation7 + $0x1], 1 }

</bundles_post_ra>
